<compile_context>
chip_gen: v7x
topology: tpu7x:2x2x1
jax: 0.10.0
libtpu: 0.0.40
codegen_flags: <defaults>
</compile_context>

<pallas_src>
import functools

import jax
import jax.numpy as jnp
from jax.experimental import pallas as pl
from jax.experimental.pallas import tpu as pltpu

DROPOUT_P = 0.1


def _sdp_kernel(scale_ref, qk_ref, bits_ref, v_ref, o_ref, *, dropout_p):
    # scale_ref lives in SMEM (scalar prefetch).  Reciprocal-multiply instead
    # of a full-tile divide.
    inv_scale = 1.0 / scale_ref[0]

    # scaled scores: (T, S, Sk)
    s = qk_ref[...].astype(jnp.float32) * inv_scale

    # numerically-stable softmax over the last dim
    s = s - jnp.max(s, axis=-1, keepdims=True)
    e = jnp.exp(s)
    denom = jnp.sum(e, axis=-1, keepdims=True)          # (T, S, 1)
    # reciprocal on the reduced (T,S,1) array, fold in the 1/(1-p) rescale,
    # then a single full-tile multiply.
    inv_den = (1.0 / (1.0 - dropout_p)) / denom

    # dropout: threshold test directly on raw uint32 bits (no shifts/converts)
    threshold = jnp.uint32(int(dropout_p * (1 << 32)))
    keep = bits_ref[...] >= threshold                    # keep prob = 1 - p
    p = jnp.where(keep, e * inv_den, 0.0)

    # batched attention matmul on the MXU; bf16 operands, f32 accumulation
    out = jnp.einsum(
        "tqk,tkd->tqd",
        p.astype(jnp.bfloat16),
        v_ref[...].astype(jnp.bfloat16),
        preferred_element_type=jnp.float32,
    )
    o_ref[...] = out.astype(o_ref.dtype)


def sdp_dropout_attention(qk, value, inv_scale_factor, key=None,
                          dropout_p=DROPOUT_P):
    """qk: (B, H, S, S) f32; value: (B, H, S, D) f32 -> (B, H, S, D) f32."""
    B, H, S, Sk = qk.shape
    D = value.shape[-1]
    BH = B * H

    qk_f = qk.reshape(BH, S, Sk)
    v_f = value.reshape(BH, Sk, D)

    if key is None:
        key = jax.random.PRNGKey(0)
    # deterministic dropout bits, generated on host side of the kernel
    bits = jax.random.bits(key, (BH, S, Sk), dtype=jnp.uint32)

    # Batch as many batch-heads per grid step as possible (<=16) that evenly
    # divide BH; each step's VMEM footprint stays tiny vs. the 64-128 MiB cap.
    T = 1
    for cand in range(min(BH, 16), 0, -1):
        if BH % cand == 0:
            T = cand
            break
    grid = (BH // T,)

    scale_arr = jnp.array([inv_scale_factor], dtype=jnp.float32)

    out = pl.pallas_call(
        functools.partial(_sdp_kernel, dropout_p=dropout_p),
        out_shape=jax.ShapeDtypeStruct((BH, S, D), qk.dtype),
        grid_spec=pltpu.PrefetchScalarGridSpec(
            num_scalar_prefetch=1,
            grid=grid,
            in_specs=[
                pl.BlockSpec((T, S, Sk), lambda i, sc: (i, 0, 0)),
                pl.BlockSpec((T, S, Sk), lambda i, sc: (i, 0, 0)),
                pl.BlockSpec((T, Sk, D), lambda i, sc: (i, 0, 0)),
            ],
            out_specs=pl.BlockSpec((T, S, D), lambda i, sc: (i, 0, 0)),
        ),
        compiler_params=pltpu.CompilerParams(
            dimension_semantics=("parallel",)),
    )(scale_arr, qk_f, bits, v_f)

    return out.reshape(B, H, S, D), bits.reshape(B, H, S, Sk)


def _reference(qk, value, inv_scale_factor, bits, dropout_p=DROPOUT_P):
    s = qk.astype(jnp.float32) / inv_scale_factor
    p = jax.nn.softmax(s, axis=-1)
    keep = bits >= jnp.uint32(int(dropout_p * (1 << 32)))
    p = jnp.where(keep, p / (1.0 - dropout_p), 0.0)
    return jnp.einsum("bhqk,bhkd->bhqd", p, value.astype(jnp.float32))


if __name__ == "__main__":
    key = jax.random.PRNGKey(0)
    k_qk, k_v, k_drop = jax.random.split(key, 3)

    # Small shapes consistent with the module's qk = randn(5, 10, 64, 64):
    # keep seq = head-dim = 64, shrink batch/heads.
    B, H, S, D = 2, 4, 64, 64
    qk = jax.random.normal(k_qk, (B, H, S, S), dtype=jnp.float32)
    value = jax.random.normal(k_v, (B, H, S, D), dtype=jnp.float32)
    inv_scale_factor = 8.0  # sqrt(head_dim)

    out, bits = sdp_dropout_attention(qk, value, inv_scale_factor, key=k_drop)
    out = jax.block_until_ready(out)

    assert out.shape == (B, H, S, D)
    assert bool(jnp.all(jnp.isfinite(out)))

    ref = _reference(qk, value, inv_scale_factor, bits)
    err = jnp.max(jnp.abs(out - ref))
    assert bool(err < 5e-2), f"max abs error {err}"  # bf16 MXU tolerance

    print("KERNEL_OK")
</pallas_src>

<mosaic_0001>
module attributes {stable_mosaic.version = 11 : i64} {
  func.func @_sdp_kernel(%arg0: i32, %arg1: memref<1xf32, #tpu.memory_space<smem>>, %arg2: memref<8x64x64xf32, #tpu.memory_space<vmem>>, %arg3: memref<8x64x64xi32, #tpu.memory_space<vmem>>, %arg4: memref<8x64x64xf32, #tpu.memory_space<vmem>>, %arg5: memref<8x64x64xf32, #tpu.memory_space<vmem>>) attributes {dimension_semantics = [#tpu.dimension_semantics<parallel>], iteration_bounds = array<i64: 1>, scalar_prefetch = 1 : i64, scratch_operands = 0 : i64, tpu.core_type = #tpu.core_type<tc>, window_params = [{transform_indices = @transform_0, window_bounds = array<i64: 8, 64, 64>}, {transform_indices = @transform_1, window_bounds = array<i64: 8, 64, 64>}, {transform_indices = @transform_2, window_bounds = array<i64: 8, 64, 64>}, {transform_indices = @transform_3, window_bounds = array<i64: 8, 64, 64>}]} {
    %c0 = arith.constant 0 : index
    %0 = memref.load %arg1[%c0] : memref<1xf32, #tpu.memory_space<smem>>
    %cst = arith.constant 1.000000e+00 : f32
    %1 = arith.divf %cst, %0 : f32
    %c0_0 = arith.constant 0 : index
    %c0_1 = arith.constant 0 : index
    %c0_2 = arith.constant 0 : index
    %2 = vector.load %arg2[%c0_0, %c0_1, %c0_2] : memref<8x64x64xf32, #tpu.memory_space<vmem>>, vector<8x64x64xf32>
    %3 = vector.broadcast %1 : f32 to vector<8x64x64xf32>
    %4 = arith.mulf %2, %3 : vector<8x64x64xf32>
    %cst_3 = arith.constant dense<0xFF800000> : vector<8x64xf32>
    %5 = vector.multi_reduction <maximumf>, %4, %cst_3 [2] : vector<8x64x64xf32> to vector<8x64xf32>
    %6 = vector.shape_cast %5 : vector<8x64xf32> to vector<8x64x1xf32>
    %7 = vector.broadcast %6 : vector<8x64x1xf32> to vector<8x64x64xf32>
    %8 = arith.subf %4, %7 : vector<8x64x64xf32>
    %9 = math.exp %8 : vector<8x64x64xf32>
    %cst_4 = arith.constant dense<0.000000e+00> : vector<8x64xf32>
    %10 = vector.multi_reduction <add>, %9, %cst_4 [2] : vector<8x64x64xf32> to vector<8x64xf32>
    %11 = vector.shape_cast %10 : vector<8x64xf32> to vector<8x64x1xf32>
    %cst_5 = arith.constant 1.11111116 : f32
    %12 = vector.broadcast %cst_5 : f32 to vector<8x64x1xf32>
    %13 = arith.divf %12, %11 : vector<8x64x1xf32>
    %c0_6 = arith.constant 0 : index
    %c0_7 = arith.constant 0 : index
    %c0_8 = arith.constant 0 : index
    %14 = vector.load %arg3[%c0_6, %c0_7, %c0_8] : memref<8x64x64xi32, #tpu.memory_space<vmem>>, vector<8x64x64xi32>
    %c429496729_i32 = arith.constant 429496729 : i32
    %15 = vector.broadcast %c429496729_i32 : i32 to vector<8x64x64xi32>
    %16 = arith.cmpi uge, %14, %15 : vector<8x64x64xi32>
    %17 = vector.broadcast %13 : vector<8x64x1xf32> to vector<8x64x64xf32>
    %18 = arith.mulf %9, %17 : vector<8x64x64xf32>
    %cst_9 = arith.constant 0.000000e+00 : f32
    %19 = vector.broadcast %cst_9 : f32 to vector<8x64x64xf32>
    %20 = arith.select %16, %18, %19 : vector<8x64x64xi1>, vector<8x64x64xf32>
    %21 = arith.truncf %20 : vector<8x64x64xf32> to vector<8x64x64xbf16>
    %c0_10 = arith.constant 0 : index
    %c0_11 = arith.constant 0 : index
    %c0_12 = arith.constant 0 : index
    %22 = vector.load %arg4[%c0_10, %c0_11, %c0_12] : memref<8x64x64xf32, #tpu.memory_space<vmem>>, vector<8x64x64xf32>
    %23 = arith.truncf %22 : vector<8x64x64xf32> to vector<8x64x64xbf16>
    "tpu.trace_start"() <{level = 10 : i32, message = "tqk,tkd->tqd"}> : () -> ()
    %cst_13 = arith.constant dense<0.000000e+00> : vector<8x64x64xf32>
    %24 = tpu.matmul %21, %23, %cst_13 {dimension_numbers = #tpu.dot_dimension_numbers<[2], [1], [1], [2], [0, 0, 0, 1, 1, 2], [0], [0]>} : vector<8x64x64xbf16>, vector<8x64x64xbf16>, vector<8x64x64xf32> -> vector<8x64x64xf32>
    "tpu.trace_stop"() : () -> ()
    %c0_14 = arith.constant 0 : index
    %c0_15 = arith.constant 0 : index
    %c0_16 = arith.constant 0 : index
    %25 = vector.load %arg5[%c0_14, %c0_15, %c0_16] : memref<8x64x64xf32, #tpu.memory_space<vmem>>, vector<8x64x64xf32>
    tpu.vector_store %arg5[%c0_14, %c0_15, %c0_16], %24 {strides = array<i32>} : memref<8x64x64xf32, #tpu.memory_space<vmem>>, vector<8x64x64xf32>,
    return
  }
  func.func @transform_0(%arg0: i32, %arg1: memref<1xf32, #tpu.memory_space<smem>>) -> (i32, i32, i32) {
    %c0_i32 = arith.constant 0 : i32
    %c0_i32_0 = arith.constant 0 : i32
    %c0_i32_1 = arith.constant 0 : i32
    return %arg0, %c0_i32, %c0_i32_0 : i32, i32, i32
  }
  func.func @transform_1(%arg0: i32, %arg1: memref<1xf32, #tpu.memory_space<smem>>) -> (i32, i32, i32) {
    %c0_i32 = arith.constant 0 : i32
    %c0_i32_0 = arith.constant 0 : i32
    %c0_i32_1 = arith.constant 0 : i32
    return %arg0, %c0_i32, %c0_i32_0 : i32, i32, i32
  }
  func.func @transform_2(%arg0: i32, %arg1: memref<1xf32, #tpu.memory_space<smem>>) -> (i32, i32, i32) {
    %c0_i32 = arith.constant 0 : i32
    %c0_i32_0 = arith.constant 0 : i32
    %c0_i32_1 = arith.constant 0 : i32
    return %arg0, %c0_i32, %c0_i32_0 : i32, i32, i32
  }
  func.func @transform_3(%arg0: i32, %arg1: memref<1xf32, #tpu.memory_space<smem>>) -> (i32, i32, i32) {
    %c0_i32 = arith.constant 0 : i32
    %c0_i32_0 = arith.constant 0 : i32
    %c0_i32_1 = arith.constant 0 : i32
    return %arg0, %c0_i32, %c0_i32_0 : i32, i32, i32
  }
}

</mosaic_0001>

<bundles_post_ra>
// kernel: tpu_custom_call.1
= control target key start
LH: loop header
LB: loop body
LE: loop exit
PB: predicated region body
PF: predicated region fallthrough
CT: control target
= control target key end

     0   :  { %10 = vsyncpa [#allocation5], 0  ;;  %s3535_s0 = inlined_call_operand.<no memory space> [shape: f32[1], index: 0, kind: input, shape index: {}]   ;;  %s3536_s1 = inlined_call_operand.hbm [shape: f32[8,64,64], index: 1, kind: input, shape index: {}]   ;;  %s3537_s2 = inlined_call_operand.hbm [shape: u32[8,64,64], index: 2, kind: input, shape index: {}]   ;;  %s3538_s3 = inlined_call_operand.hbm [shape: f32[8,64,64], index: 3, kind: input, shape index: {}]   ;;  %s3539_s4 = inlined_call_operand.hbm [shape: f32[8,64,64], index: 4, kind: output, shape index: {}]  }
   0x1   :  { %11 = vsyncpa [#allocation8], 0 }
   0x2   :  { %12 = vsyncpa [#allocation6], 0  ;;  %s2563_s15 = smov [#allocation7]   ;;  %s2564_s17 = smov [#allocation4]  }
   0x3   :  { %s30_s16 = sshll.u32 %s2563_s15, 4  ;;  %s18_s18 = sshll.u32 %s2564_s17, 4  ;;  %s31_s16 = int_to_ptr.vmem [resolvable:$true] %s30_s16  ;;  %s2594_s18 = int_to_ptr.vmem [resolvable:$true] %s18_s18 }
   0x4   :  { %s2469_s21 = scalar_lea.hbm %s3537_s2, 8192 }
   0x5   :  { %p2470_p0 = scmp.ne.s32.totalorder %s3537_s2, %s2469_s21  ;;  %p2473_p1 = scmp.lt.u32.totalorder %s2469_s21, %s3537_s2 }
   0x7   :  { %p2475_p2 = pnand %p2473_p1, %p2470_p0 }
   0x9   :  { %2478 = shalt.err (!%p2475_p2)
}
   0xa   :  { %s2479_s26 = scalar_lea.vmem %s31_s16, 8192  ;;  %p2484_p4 = scmp.lt.s32.totalorder %s31_s16, %s31_s16 }
   0xb   :  { %p2480_p3 = scmp.ne.s32.totalorder %s31_s16, %s2479_s26  ;;  %p2485_p5 = scmp.lt.s32.totalorder %s2479_s26, %s2479_s26 }
   0xd   :  { %p2486_p6 = por %p2485_p5, %p2484_p4 }
   0xf   :  { %p2487_p7 = pnand %p2486_p6, %p2480_p3 }
  0x11   :  { %2490 = shalt.err (!%p2487_p7)
}
  0x12   :  { %s2565_s27 = smov 128   ;;  %s2566_s28 = smov 8  }
  0x13   :  { %36 = dma.hbm_to_vmem [thread:$0]  %s3537_s2, 8192, %s31_s16, [#allocation8], %s2565_s27, %s2565_s27, %s2566_s28  }
  0x14   :  { %s2491_s7 = scalar_lea.hbm %s3536_s1, 8192 }
  0x15   :  { %p2492_p8 = scmp.ne.s32.totalorder %s3536_s1, %s2491_s7  ;;  %p2495_p9 = scmp.lt.u32.totalorder %s2491_s7, %s3536_s1 }
  0x17   :  { %p2497_p10 = pnand %p2495_p9, %p2492_p8 }
  0x19   :  { %2500 = shalt.err (!%p2497_p10)
}
  0x1a   :  { %s2501_s12 = scalar_lea.vmem %s2594_s18, 8192  ;;  %p2506_p12 = scmp.lt.s32.totalorder %s2594_s18, %s2594_s18 }
  0x1b   :  { %p2502_p11 = scmp.ne.s32.totalorder %s2594_s18, %s2501_s12  ;;  %p2507_p13 = scmp.lt.s32.totalorder %s2501_s12, %s2501_s12 }
  0x1d   :  { %p2508_p0 = por %p2507_p13, %p2506_p12 }
  0x1f   :  { %p2509_p1 = pnand %p2508_p0, %p2502_p11 }
  0x21   :  { %2512 = shalt.err (!%p2509_p1)
}
  0x22   :  { %24 = dma.hbm_to_vmem [thread:$0]  %s3536_s1, 8192, %s2594_s18, [#allocation5], %s2565_s27, %s2565_s27, %s2566_s28  }
  0x23   :  { %s2567_s14 = smov [#allocation9]   ;;  %s2513_s19 = scalar_lea.hbm %s3538_s3, 8192 }
  0x24   :  { %s42_s15 = sshll.u32 %s2567_s14, 4  ;;  %p2514_p2 = scmp.ne.s32.totalorder %s3538_s3, %s2513_s19  ;;  %s43_s15 = int_to_ptr.vmem [resolvable:$true] %s42_s15 }
  0x25   :  { %p2517_p3 = scmp.lt.u32.totalorder %s2513_s19, %s3538_s3 }
  0x27   :  { %p2519_p4 = pnand %p2517_p3, %p2514_p2 }
  0x29   :  { %2522 = shalt.err (!%p2519_p4)
}
  0x2a   :  { %s2523_s24 = scalar_lea.vmem %s43_s15, 8192  ;;  %p2528_p6 = scmp.lt.s32.totalorder %s43_s15, %s43_s15 }
  0x2b   :  { %p2524_p5 = scmp.ne.s32.totalorder %s43_s15, %s2523_s24  ;;  %p2529_p7 = scmp.lt.s32.totalorder %s2523_s24, %s2523_s24 }
  0x2d   :  { %p2530_p8 = por %p2529_p7, %p2528_p6 }
  0x2f   :  { %p2531_p9 = pnand %p2530_p8, %p2524_p5 }
  0x31   :  { %2534 = shalt.err (!%p2531_p9)
}
  0x32   :  { %48 = dma.hbm_to_vmem [thread:$0]  %s3538_s3, 8192, %s43_s15, [#allocation8], %s2565_s27, %s2565_s27, %s2566_s28  }
  0x33   :  { %2557 = dma.done.wait [#allocation5], 8192  }
  0x34   :  { %2558 = vsyncadd [#allocation5], 4294959104  ;;  %v60_v0 = vstv %s3535_s0 }
  0x35   :  { %2559 = dma.done.wait [#allocation8], 16384  }
  0x36   :  { %2560 = vsyncadd [#allocation8], 4294950912  ;;  %2211 = vrcp.f32 %v60_v0  ;;  %v71_v2 = vld [vmem:[#allocation4 + $0x40] sm:$0xff]  ;;  %vm192_vm0 = vcmask 523264   ;;  %v72_v5 = vld [vmem:[#allocation4 + $0x48] sm:$0xff]  ;;  %s2568_s0 = smov [#allocation10]  }
  0x37   :  { %v63_v3 = vld [vmem:[#allocation4] sm:$0xff]  ;;  %v64_v6 = vld [vmem:[#allocation4 + $0x8] sm:$0xff]  ;;  %v66_v13 = vld [vmem:[#allocation4 + $0x18] sm:$0xff]  ;;  %s1966_s3 = sshll.u32 %s2568_s0, 4  ;;  %s1967_s3 = int_to_ptr.vmem [resolvable:$true] %s1966_s3 }
  0x38   :  { %v65_v14 = vld [vmem:[#allocation4 + $0x10] sm:$0xff]  ;;  %v74_v19 = vld [vmem:[#allocation4 + $0x58] sm:$0xff]  ;;  %v68_v25 = vld [vmem:[#allocation4 + $0x28] sm:$0xff]  ;;  %s2535_s30 = scalar_lea.vmem %s1967_s3, 8192  ;;  %p2540_p11 = scmp.lt.s32.totalorder %s1967_s3, %s1967_s3 }
  0x39   :  { %v73_v20 = vld [vmem:[#allocation4 + $0x50] sm:$0xff]  ;;  %v67_v26 = vld [vmem:[#allocation4 + $0x20] sm:$0xff]  ;;  %v76_v31 = vld [vmem:[#allocation4 + $0x68] sm:$0xff]  ;;  %p2536_p10 = scmp.ne.s32.totalorder %s1967_s3, %s2535_s30  ;;  %p2541_p12 = scmp.lt.s32.totalorder %s2535_s30, %s2535_s30 }
  0x3a   :  { %v75_v32 = vld [vmem:[#allocation4 + $0x60] sm:$0xff]  ;;  %v70_v37 = vld [vmem:[#allocation4 + $0x38] sm:$0xff]  ;;  %v69_v38 = vld [vmem:[#allocation4 + $0x30] sm:$0xff] }
  0x3b   :  { %v78_v43 = vld [vmem:[#allocation4 + $0x78] sm:$0xff]  ;;  %v77_v44 = vld [vmem:[#allocation4 + $0x70] sm:$0xff]  ;;  %v80_v49 = vld [vmem:[#allocation4 + $0x88] sm:$0xff]  ;;  %p2542_p13 = por %p2541_p12, %p2540_p11 }
  0x3c   :  { %v79_v50 = vld [vmem:[#allocation4 + $0x80] sm:$0xff]  ;;  %v88_v55 = vld [vmem:[#allocation4 + $0xc8] sm:$0xff]  ;;  %v82_v61 = vld [vmem:[#allocation4 + $0x98] sm:$0xff] }
  0x3d   :  { %v87_v56 = vld [vmem:[#allocation4 + $0xc0] sm:$0xff]  ;;  %v81_v62 = vld [vmem:[#allocation4 + $0x90] sm:$0xff]  ;;  %p2543_p0 = pnand %p2542_p13, %p2536_p10 }
  0x40   :  { %v2212_v1 = vpop.eup %2211 }
  0x41   :  { %2203 = vpush %v2212_v1 }
  0x72   :  { %s2204_s29 = spop %2203 }
  0x73   :  { %v2649_v4 = vstv %s2204_s29 }
  0x74   :  { %v2652_v7 = vmul.f32 %v2649_v4, %v71_v2  ;;  %v2655_v8 = vmul.f32 %v2649_v4, %v63_v3  ;;  %v2662_v11 = vmul.f32 %v2649_v4, %v72_v5  ;;  %v2665_v12 = vmul.f32 %v2649_v4, %v64_v6  ;;  %v90_v3 = vld [vmem:[#allocation4 + $0xd8] sm:$0xff]  ;;  %v89_v5 = vld [vmem:[#allocation4 + $0xd0] sm:$0xff] }
  0x75   :  { %v2672_v17 = vmul.f32 %v2649_v4, %v66_v13  ;;  %v2675_v18 = vmul.f32 %v2649_v4, %v65_v14  ;;  %v2682_v23 = vmul.f32 %v2649_v4, %v74_v19  ;;  %v2685_v24 = vmul.f32 %v2649_v4, %v73_v20  ;;  %v84_v14 = vld [vmem:[#allocation4 + $0xa8] sm:$0xff] }
  0x76   :  { %v217_v9 = vsel %vm192_vm0, %v2652_v7, -inf  ;;  %v193_v10 = vsel %vm192_vm0, %v2655_v8, -inf  ;;  %v220_v15 = vsel %vm192_vm0, %v2662_v11, -inf  ;;  %v196_v16 = vsel %vm192_vm0, %v2665_v12, -inf }
  0x77   :  { %218 = vmax.xlane.f32.xlu1 %v217_v9  ;;  %194 = vmax.xlane.f32.xlu0 %v193_v10  ;;  %v202_v21 = vsel %vm192_vm0, %v2672_v17, -inf  ;;  %v199_v22 = vsel %vm192_vm0, %v2675_v18, -inf  ;;  %v226_v27 = vsel %vm192_vm0, %v2682_v23, -inf  ;;  %v223_v28 = vsel %vm192_vm0, %v2685_v24, -inf }
  0x78   :  { %v2692_v29 = vmul.f32 %v2649_v4, %v68_v25  ;;  %v2695_v30 = vmul.f32 %v2649_v4, %v67_v26  ;;  %v2702_v35 = vmul.f32 %v2649_v4, %v76_v31  ;;  %v2705_v36 = vmul.f32 %v2649_v4, %v75_v32  ;;  %v91_v25 = vld [vmem:[#allocation4 + $0xe0] sm:$0xff]  ;;  %v86_v32 = vld [vmem:[#allocation4 + $0xb8] sm:$0xff] }
  0x79   :  { %v2712_v41 = vmul.f32 %v2649_v4, %v70_v37  ;;  %v2715_v42 = vmul.f32 %v2649_v4, %v69_v38  ;;  %v2722_v47 = vmul.f32 %v2649_v4, %v78_v43  ;;  %v2725_v48 = vmul.f32 %v2649_v4, %v77_v44  ;;  %v93_v43 = vld [vmem:[#allocation4 + $0xf0] sm:$0xff] }
  0x7a   :  { %v208_v33 = vsel %vm192_vm0, %v2692_v29, -inf  ;;  %v205_v34 = vsel %vm192_vm0, %v2695_v30, -inf  ;;  %v232_v39 = vsel %vm192_vm0, %v2702_v35, -inf  ;;  %v229_v40 = vsel %vm192_vm0, %v2705_v36, -inf }
  0x7b   :  { %221 = vmax.xlane.f32.xlu1 %v220_v15  ;;  %197 = vmax.xlane.f32.xlu0 %v196_v16  ;;  %v214_v45 = vsel %vm192_vm0, %v2712_v41, -inf  ;;  %v211_v46 = vsel %vm192_vm0, %v2715_v42, -inf  ;;  %v238_v51 = vsel %vm192_vm0, %v2722_v47, -inf  ;;  %v235_v52 = vsel %vm192_vm0, %v2725_v48, -inf  ;;  %v83_v15 = vld [vmem:[#allocation4 + $0xa0] sm:$0xff] }
  0x7c   :  { %v2732_v53 = vmul.f32 %v2649_v4, %v80_v49  ;;  %v2735_v54 = vmul.f32 %v2649_v4, %v79_v50  ;;  %v2742_v59 = vmul.f32 %v2649_v4, %v88_v55  ;;  %v2745_v60 = vmul.f32 %v2649_v4, %v87_v56  ;;  %v96_v50 = vld [vmem:[#allocation4 + $0x108] sm:$0xff] }
  0x7d   :  { %v2752_v1 = vmul.f32 %v2649_v4, %v82_v61  ;;  %v2755_v2 = vmul.f32 %v2649_v4, %v81_v62  ;;  %v2762_v10 = vmul.f32 %v2649_v4, %v90_v3  ;;  %v2765_v13 = vmul.f32 %v2649_v4, %v89_v5  ;;  %v103_v61 = vld [vmem:[#allocation4 + $0x140] sm:$0xff]  ;;  %v98_v5 = vld [vmem:[#allocation4 + $0x118] sm:$0xff] }
  0x7e   :  { %v244_v57 = vsel %vm192_vm0, %v2732_v53, -inf  ;;  %v241_v58 = vsel %vm192_vm0, %v2735_v54, -inf  ;;  %v268_v63 = vsel %vm192_vm0, %v2742_v59, -inf  ;;  %v265_v0 = vsel %vm192_vm0, %v2745_v60, -inf }
  0x7f   :  { %203 = vmax.xlane.f32.xlu1 %v202_v21  ;;  %200 = vmax.xlane.f32.xlu0 %v199_v22  ;;  %v250_v6 = vsel %vm192_vm0, %v2752_v1, -inf  ;;  %v247_v9 = vsel %vm192_vm0, %v2755_v2, -inf  ;;  %v274_v16 = vsel %vm192_vm0, %v2762_v10, -inf  ;;  %v271_v19 = vsel %vm192_vm0, %v2765_v13, -inf  ;;  %v92_v22 = vld [vmem:[#allocation4 + $0xe8] sm:$0xff] }
  0x80   :  { %v2772_v20 = vmul.f32 %v2649_v4, %v84_v14  ;;  %v2775_v21 = vmul.f32 %v2649_v4, %v83_v15  ;;  %v2785_v31 = vmul.f32 %v2649_v4, %v91_v25  ;;  %v2792_v38 = vmul.f32 %v2649_v4, %v86_v32 }
  0x81   :  { %v2805_v49 = vmul.f32 %v2649_v4, %v93_v43  ;;  %v2812_v56 = vmul.f32 %v2649_v4, %v96_v50  ;;  %v2825_v3 = vmul.f32 %v2649_v4, %v103_v61  ;;  %v2832_v15 = vmul.f32 %v2649_v4, %v98_v5  ;;  %v107_v50 = vld [vmem:[#allocation4 + $0x160] sm:$0xff]  ;;  %v102_v61 = vld [vmem:[#allocation4 + $0x138] sm:$0xff] }
  0x82   :  { %v256_v26 = vsel %vm192_vm0, %v2772_v20, -inf  ;;  %v277_v37 = vsel %vm192_vm0, %v2785_v31, -inf  ;;  %v262_v44 = vsel %vm192_vm0, %v2792_v38, -inf }
  0x83   :  { %227 = vmax.xlane.f32.xlu1 %v226_v27  ;;  %224 = vmax.xlane.f32.xlu0 %v223_v28  ;;  %v253_v27 = vsel %vm192_vm0, %v2775_v21, -inf  ;;  %v2782_v28 = vmul.f32 %v2649_v4, %v92_v22  ;;  %v283_v55 = vsel %vm192_vm0, %v2805_v49, -inf  ;;  %v292_v62 = vsel %vm192_vm0, %v2812_v56, -inf  ;;  %v105_v22 = vld [vmem:[#allocation4 + $0x150] sm:$0xff] }
  0x84   :  { %v313_v14 = vsel %vm192_vm0, %v2825_v3, -inf  ;;  %v298_v25 = vsel %vm192_vm0, %v2832_v15, -inf  ;;  %v2845_v32 = vmul.f32 %v2649_v4, %v105_v22 }
  0x87   :  { %209 = vmax.xlane.f32.xlu1 %v208_v33  ;;  %206 = vmax.xlane.f32.xlu0 %v205_v34  ;;  %v85_v33 = vld [vmem:[#allocation4 + $0xb0] sm:$0xff]  ;;  %v280_v34 = vsel %vm192_vm0, %v2782_v28, -inf }
  0x8b   :  { %233 = vmax.xlane.f32.xlu1 %v232_v39  ;;  %230 = vmax.xlane.f32.xlu0 %v229_v40  ;;  %v2795_v39 = vmul.f32 %v2649_v4, %v85_v33  ;;  %v94_v40 = vld [vmem:[#allocation4 + $0xf8] sm:$0xff]  ;;  %v100_v33 = vld [vmem:[#allocation4 + $0x128] sm:$0xff] }
  0x8c   :  { %v2852_v43 = vmul.f32 %v2649_v4, %v100_v33 }
  0x8f   :  { %215 = vmax.xlane.f32.xlu1 %v214_v45  ;;  %212 = vmax.xlane.f32.xlu0 %v211_v46  ;;  %v259_v45 = vsel %vm192_vm0, %v2795_v39, -inf  ;;  %v2802_v46 = vmul.f32 %v2649_v4, %v94_v40  ;;  %v319_v40 = vsel %vm192_vm0, %v2845_v32, -inf }
  0x93   :  { %239 = vmax.xlane.f32.xlu1 %v238_v51  ;;  %236 = vmax.xlane.f32.xlu0 %v235_v52  ;;  %v95_v51 = vld [vmem:[#allocation4 + $0x100] sm:$0xff]  ;;  %v286_v52 = vsel %vm192_vm0, %v2802_v46, -inf }
  0x97   :  { %245 = vmax.xlane.f32.xlu1 %v244_v57  ;;  %242 = vmax.xlane.f32.xlu0 %v241_v58  ;;  %v2815_v57 = vmul.f32 %v2649_v4, %v95_v51  ;;  %v104_v58 = vld [vmem:[#allocation4 + $0x148] sm:$0xff]  ;;  %v304_v51 = vsel %vm192_vm0, %v2852_v43, -inf }
  0x9b   :  { %269 = vmax.xlane.f32.xlu1 %v268_v63  ;;  %266 = vmax.xlane.f32.xlu0 %v265_v0  ;;  %v289_v63 = vsel %vm192_vm0, %v2815_v57, -inf  ;;  %v2822_v0 = vmul.f32 %v2649_v4, %v104_v58  ;;  %v2865_v58 = vmul.f32 %v2649_v4, %v107_v50 }
  0x9d   :  { %v325_v5 = vsel %vm192_vm0, %v2865_v58, -inf }
  0x9f   :  { %251 = vmax.xlane.f32.xlu1 %v250_v6  ;;  %248 = vmax.xlane.f32.xlu0 %v247_v9  ;;  %v97_v6 = vld [vmem:[#allocation4 + $0x110] sm:$0xff]  ;;  %v316_v9 = vsel %vm192_vm0, %v2822_v0, -inf }
  0xa3   :  { %275 = vmax.xlane.f32.xlu1 %v274_v16  ;;  %272 = vmax.xlane.f32.xlu0 %v271_v19  ;;  %v2835_v16 = vmul.f32 %v2649_v4, %v97_v6  ;;  %v106_v19 = vld [vmem:[#allocation4 + $0x158] sm:$0xff]  ;;  %v2872_v6 = vmul.f32 %v2649_v4, %v102_v61  ;;  %v119_v61 = vld [vmem:[#allocation4 + $0x1c0] sm:$0xff] }
  0xa5   :  { %v310_v22 = vsel %vm192_vm0, %v2872_v6, -inf }
  0xa7   :  { %257 = vmax.xlane.f32.xlu1 %v256_v26  ;;  %254 = vmax.xlane.f32.xlu0 %v253_v27  ;;  %v295_v26 = vsel %vm192_vm0, %v2835_v16, -inf  ;;  %v2842_v27 = vmul.f32 %v2649_v4, %v106_v19  ;;  %v109_v19 = vld [vmem:[#allocation4 + $0x170] sm:$0xff] }
  0xa8   :  { %v2885_v33 = vmul.f32 %v2649_v4, %v109_v19  ;;  %v114_v19 = vld [vmem:[#allocation4 + $0x198] sm:$0xff] }
  0xab   :  { %281 = vmax.xlane.f32.xlu1 %v280_v34  ;;  %278 = vmax.xlane.f32.xlu0 %v277_v37  ;;  %v99_v34 = vld [vmem:[#allocation4 + $0x120] sm:$0xff]  ;;  %v322_v37 = vsel %vm192_vm0, %v2842_v27, -inf }
  0xaf   :  { %263 = vmax.xlane.f32.xlu1 %v262_v44  ;;  %260 = vmax.xlane.f32.xlu0 %v259_v45  ;;  %v2855_v44 = vmul.f32 %v2649_v4, %v99_v34  ;;  %v108_v45 = vld [vmem:[#allocation4 + $0x168] sm:$0xff] }
  0xb0   :  { %v112_v34 = vld [vmem:[#allocation4 + $0x188] sm:$0xff] }
  0xb1   :  { %v2892_v50 = vmul.f32 %v2649_v4, %v112_v34 }
  0xb3   :  { %287 = vmax.xlane.f32.xlu1 %v286_v52  ;;  %284 = vmax.xlane.f32.xlu0 %v283_v55  ;;  %v301_v52 = vsel %vm192_vm0, %v2855_v44, -inf  ;;  %v2862_v55 = vmul.f32 %v2649_v4, %v108_v45  ;;  %v331_v45 = vsel %vm192_vm0, %v2885_v33, -inf }
  0xb7   :  { %293 = vmax.xlane.f32.xlu1 %v292_v62  ;;  %290 = vmax.xlane.f32.xlu0 %v289_v63  ;;  %v101_v62 = vld [vmem:[#allocation4 + $0x130] sm:$0xff]  ;;  %v328_v63 = vsel %vm192_vm0, %v2862_v55, -inf }
  0xbb   :  { %317 = vmax.xlane.f32.xlu1 %v316_v9  ;;  %314 = vmax.xlane.f32.xlu0 %v313_v14  ;;  %v2875_v9 = vmul.f32 %v2649_v4, %v101_v62  ;;  %v110_v14 = vld [vmem:[#allocation4 + $0x178] sm:$0xff]  ;;  %v340_v62 = vsel %vm192_vm0, %v2892_v50, -inf }
  0xbf   :  { %299 = vmax.xlane.f32.xlu1 %v298_v25  ;;  %296 = vmax.xlane.f32.xlu0 %v295_v26  ;;  %v307_v25 = vsel %vm192_vm0, %v2875_v9, -inf  ;;  %v2882_v26 = vmul.f32 %v2649_v4, %v110_v14  ;;  %v2905_v14 = vmul.f32 %v2649_v4, %v119_v61 }
  0xc1   :  { %3580 = vst [vmem:[#allocation16_spill] sm:$0xff] %v2905_v14  ;;  %v361_v34 = vsel %vm192_vm0, %v2905_v14, -inf }
  0xc3   :  { %323 = vmax.xlane.f32.xlu1 %v322_v37  ;;  %320 = vmax.xlane.f32.xlu0 %v319_v40  ;;  %v111_v37 = vld [vmem:[#allocation4 + $0x180] sm:$0xff]  ;;  %v334_v40 = vsel %vm192_vm0, %v2882_v26, -inf }
  0xc7   :  { %305 = vmax.xlane.f32.xlu1 %v304_v51  ;;  %302 = vmax.xlane.f32.xlu0 %v301_v52  ;;  %v2895_v51 = vmul.f32 %v2649_v4, %v111_v37  ;;  %v120_v52 = vld [vmem:[#allocation4 + $0x1c8] sm:$0xff]  ;;  %v2912_v37 = vmul.f32 %v2649_v4, %v114_v19 }
  0xc8   :  { %v116_v19 = vld [vmem:[#allocation4 + $0x1a8] sm:$0xff] }
  0xc9   :  { %3578 = vst [vmem:[#allocation14_spill] sm:$0xff] %v2895_v51  ;;  %3581 = vst [vmem:[#allocation17_spill] sm:$0xff] %v2912_v37  ;;  %v346_v61 = vsel %vm192_vm0, %v2912_v37, -inf  ;;  %v2932_v37 = vmul.f32 %v2649_v4, %v116_v19  ;;  %v118_v19 = vld [vmem:[#allocation4 + $0x1b8] sm:$0xff] }
  0xcb   :  { %329 = vmax.xlane.f32.xlu1 %v328_v63  ;;  %326 = vmax.xlane.f32.xlu0 %v325_v5  ;;  %v337_v63 = vsel %vm192_vm0, %v2895_v51, -inf  ;;  %v2902_v5 = vmul.f32 %v2649_v4, %v120_v52  ;;  %v121_v52 = vld [vmem:[#allocation4 + $0x1d0] sm:$0xff]  ;;  %3585 = vst [vmem:[#allocation21_spill] sm:$0xff] %v2932_v37 }
  0xcc   :  { %v2925_v14 = vmul.f32 %v2649_v4, %v121_v52  ;;  %v123_v52 = vld [vmem:[#allocation4 + $0x1e0] sm:$0xff] }
  0xcd   :  { %3579 = vst [vmem:[#allocation15_spill] sm:$0xff] %v2902_v5 }
  0xce   :  { %3584 = vst [vmem:[#allocation20_spill] sm:$0xff] %v2925_v14 }
  0xcf   :  { %311 = vmax.xlane.f32.xlu1 %v310_v22  ;;  %308 = vmax.xlane.f32.xlu0 %v307_v25  ;;  %v113_v22 = vld [vmem:[#allocation4 + $0x190] sm:$0xff]  ;;  %v364_v25 = vsel %vm192_vm0, %v2902_v5, -inf }
  0xd3   :  { %335 = vmax.xlane.f32.xlu1 %v334_v40  ;;  %332 = vmax.xlane.f32.xlu0 %v331_v45  ;;  %v2915_v40 = vmul.f32 %v2649_v4, %v113_v22  ;;  %v122_v45 = vld [vmem:[#allocation4 + $0x1d8] sm:$0xff]  ;;  %v115_v22 = vld [vmem:[#allocation4 + $0x1a0] sm:$0xff] }
  0xd5   :  { %3582 = vst [vmem:[#allocation18_spill] sm:$0xff] %v2915_v40 }
  0xd7   :  { %341 = vmax.xlane.f32.xlu1 %v340_v62  ;;  %338 = vmax.xlane.f32.xlu0 %v337_v63  ;;  %v343_v62 = vsel %vm192_vm0, %v2915_v40, -inf  ;;  %v2922_v63 = vmul.f32 %v2649_v4, %v122_v45  ;;  %v2935_v40 = vmul.f32 %v2649_v4, %v115_v22  ;;  %v124_v45 = vld [vmem:[#allocation4 + $0x1e8] sm:$0xff]  ;;  %v117_v22 = vld [vmem:[#allocation4 + $0x1b0] sm:$0xff] }
  0xd9   :  { %3583 = vst [vmem:[#allocation19_spill] sm:$0xff] %v2922_v63  ;;  %3586 = vst [vmem:[#allocation22_spill] sm:$0xff] %v2935_v40 }
  0xdb   :  { %365 = vmax.xlane.f32.xlu1 %v364_v25  ;;  %362 = vmax.xlane.f32.xlu0 %v361_v34  ;;  %v370_v25 = vsel %vm192_vm0, %v2922_v63, -inf  ;;  %v367_v34 = vsel %vm192_vm0, %v2925_v14, -inf  ;;  %v2942_v63 = vmul.f32 %v2649_v4, %v124_v45  ;;  %v2945_v14 = vmul.f32 %v2649_v4, %v123_v52  ;;  %v126_v45 = vld [vmem:[#allocation4 + $0x1f8] sm:$0xff]  ;;  %v125_v52 = vld [vmem:[#allocation4 + $0x1f0] sm:$0xff] }
  0xdd   :  { %3587 = vst [vmem:[#allocation23_spill] sm:$0xff] %v2942_v63  ;;  %3588 = vst [vmem:[#allocation24_spill] sm:$0xff] %v2945_v14 }
  0xdf   :  { %347 = vmax.xlane.f32.xlu1 %v346_v61  ;;  %344 = vmax.xlane.f32.xlu0 %v343_v62  ;;  %v352_v61 = vsel %vm192_vm0, %v2932_v37, -inf  ;;  %v349_v62 = vsel %vm192_vm0, %v2935_v40, -inf  ;;  %v2952_v37 = vmul.f32 %v2649_v4, %v118_v19  ;;  %v2955_v40 = vmul.f32 %v2649_v4, %v117_v22 }
  0xe1   :  { %3589 = vst [vmem:[#allocation25_spill] sm:$0xff] %v2952_v37  ;;  %3590 = vst [vmem:[#allocation26_spill] sm:$0xff] %v2955_v40 }
  0xe3   :  { %371 = vmax.xlane.f32.xlu1 %v370_v25  ;;  %368 = vmax.xlane.f32.xlu0 %v367_v34  ;;  %v376_v25 = vsel %vm192_vm0, %v2942_v63, -inf  ;;  %v373_v34 = vsel %vm192_vm0, %v2945_v14, -inf  ;;  %v2962_v63 = vmul.f32 %v2649_v4, %v126_v45  ;;  %v2965_v14 = vmul.f32 %v2649_v4, %v125_v52 }
  0xe5   :  { %3591 = vst [vmem:[#allocation27_spill] sm:$0xff] %v2962_v63  ;;  %3592 = vst [vmem:[#allocation28_spill] sm:$0xff] %v2965_v14  ;;  %v382_v19 = vsel %vm192_vm0, %v2962_v63, -inf  ;;  %v379_v22 = vsel %vm192_vm0, %v2965_v14, -inf }
  0xe7   :  { %353 = vmax.xlane.f32.xlu1 %v352_v61  ;;  %350 = vmax.xlane.f32.xlu0 %v349_v62  ;;  %v358_v61 = vsel %vm192_vm0, %v2952_v37, -inf  ;;  %v355_v62 = vsel %vm192_vm0, %v2955_v40, -inf }
  0xeb   :  { %377 = vmax.xlane.f32.xlu1 %v376_v25  ;;  %374 = vmax.xlane.f32.xlu0 %v373_v34 }
  0xef   :  { %359 = vmax.xlane.f32.xlu1 %v358_v61  ;;  %356 = vmax.xlane.f32.xlu0 %v355_v62 }
  0xf3   :  { %383 = vmax.xlane.f32.xlu1 %v382_v19  ;;  %380 = vmax.xlane.f32.xlu0 %v379_v22 }
 0x104   :  { %v219_v25 = vpop.xlane.xlu1 %218  ;;  %v195_v34 = vpop.xlane.xlu0 %194 }
 0x105   :  { %v393_v40 = vsub.f32 %v2652_v7, %v219_v25  ;;  %v385_v45 = vsub.f32 %v2655_v8, %v195_v34 }
 0x107   :  { %v449_v37 = vmul.f32 1.442695, %v385_v45  ;;  %v465_v5 = vmul.f32 1.442695, %v393_v40 }
 0x108   :  { %v222_v4 = vpop.xlane.xlu1 %221  ;;  %v198_v52 = vpop.xlane.xlu0 %197 }
 0x109   :  { %v394_v61 = vsub.f32 %v2662_v11, %v222_v4  ;;  %v386_v62 = vsub.f32 %v2665_v12, %v198_v52  ;;  %2213 = vpow2.f32 %v449_v37 }
 0x10a   :  { %2215 = vpow2.f32 %v465_v5 }
 0x10b   :  { %v451_v63 = vmul.f32 1.442695, %v386_v62  ;;  %v467_v14 = vmul.f32 1.442695, %v394_v61 }
 0x10c   :  { %v204_v19 = vpop.xlane.xlu1 %203  ;;  %v201_v22 = vpop.xlane.xlu0 %200 }
 0x10d   :  { %v388_v51 = vsub.f32 %v2672_v17, %v204_v19  ;;  %v387_v7 = vsub.f32 %v2675_v18, %v201_v22  ;;  %2217 = vpow2.f32 %v451_v63 }
 0x10e   :  { %2219 = vpow2.f32 %v467_v14 }
 0x10f   :  { %v453_v8 = vmul.f32 1.442695, %v387_v7  ;;  %v455_v40 = vmul.f32 1.442695, %v388_v51 }
 0x110   :  { %v228_v25 = vpop.xlane.xlu1 %227  ;;  %v225_v34 = vpop.xlane.xlu0 %224 }
 0x111   :  { %v396_v11 = vsub.f32 %v2682_v23, %v228_v25  ;;  %v395_v12 = vsub.f32 %v2685_v24, %v225_v34  ;;  %2221 = vpow2.f32 %v453_v8 }
 0x112   :  { %2223 = vpow2.f32 %v455_v40 }
 0x113   :  { %v469_v37 = vmul.f32 1.442695, %v395_v12  ;;  %v2979_v5 = vpop.eup %2213  ;;  %v471_v45 = vmul.f32 1.442695, %v396_v11 }
 0x114   :  { %v210_v4 = vpop.xlane.xlu1 %209  ;;  %v207_v17 = vpop.xlane.xlu0 %206  ;;  %v577_v51 = vsel %vm192_vm0, %v2979_v5, 0.0 }
 0x115   :  { %v390_v18 = vsub.f32 %v2692_v29, %v210_v4  ;;  %v389_v63 = vsub.f32 %v2695_v30, %v207_v17  ;;  %v2985_v14 = vpop.eup %2215  ;;  %2225 = vpow2.f32 %v469_v37  ;;  %578 = vadd.xlane.f32.xlu0 %v577_v51 }
 0x116   :  { %2227 = vpow2.f32 %v471_v45  ;;  %v601_v30 = vsel %vm192_vm0, %v2985_v14, 0.0 }
 0x117   :  { %v457_v23 = vmul.f32 1.442695, %v389_v63  ;;  %v2987_v24 = vpop.eup %2217  ;;  %v459_v52 = vmul.f32 1.442695, %v390_v18 }
 0x118   :  { %v234_v61 = vpop.xlane.xlu1 %233  ;;  %v231_v62 = vpop.xlane.xlu0 %230  ;;  %v580_v22 = vsel %vm192_vm0, %v2987_v24, 0.0 }
 0x119   :  { %v398_v19 = vsub.f32 %v2702_v35, %v234_v61  ;;  %v397_v29 = vsub.f32 %v2705_v36, %v231_v62  ;;  %v2995_v7 = vpop.eup %2219  ;;  %2229 = vpow2.f32 %v457_v23  ;;  %602 = vadd.xlane.f32.xlu0 %v601_v30  ;;  %581 = vadd.xlane.f32.xlu1 %v580_v22 }
 0x11a   :  { %2231 = vpow2.f32 %v459_v52  ;;  %v604_v12 = vsel %vm192_vm0, %v2995_v7, 0.0 }
 0x11b   :  { %v473_v8 = vmul.f32 1.442695, %v397_v29  ;;  %v2997_v40 = vpop.eup %2221  ;;  %v475_v25 = vmul.f32 1.442695, %v398_v19 }
 0x11c   :  { %v216_v34 = vpop.xlane.xlu1 %215  ;;  %v213_v35 = vpop.xlane.xlu0 %212  ;;  %v583_v37 = vsel %vm192_vm0, %v2997_v40, 0.0 }
 0x11d   :  { %v392_v36 = vsub.f32 %v2712_v41, %v216_v34  ;;  %v391_v11 = vsub.f32 %v2715_v42, %v213_v35  ;;  %v3005_v45 = vpop.eup %2223  ;;  %2233 = vpow2.f32 %v473_v8  ;;  %605 = vadd.xlane.f32.xlu1 %v604_v12  ;;  %584 = vadd.xlane.f32.xlu0 %v583_v37 }
 0x11e   :  { %2235 = vpow2.f32 %v475_v25  ;;  %v586_v23 = vsel %vm192_vm0, %v3005_v45, 0.0 }
 0x11f   :  { %v461_v4 = vmul.f32 1.442695, %v391_v11  ;;  %v3007_v17 = vpop.eup %2225  ;;  %v463_v18 = vmul.f32 1.442695, %v392_v36 }
 0x120   :  { %v240_v63 = vpop.xlane.xlu1 %239  ;;  %v237_v41 = vpop.xlane.xlu0 %236  ;;  %v607_v52 = vsel %vm192_vm0, %v3007_v17, 0.0 }
 0x121   :  { %v400_v42 = vsub.f32 %v2722_v47, %v240_v63  ;;  %v399_v51 = vsub.f32 %v2725_v48, %v237_v41  ;;  %v3015_v61 = vpop.eup %2227  ;;  %2237 = vpow2.f32 %v461_v4  ;;  %587 = vadd.xlane.f32.xlu1 %v586_v23  ;;  %608 = vadd.xlane.f32.xlu0 %v607_v52 }
 0x122   :  { %2239 = vpow2.f32 %v463_v18  ;;  %v610_v8 = vsel %vm192_vm0, %v3015_v61, 0.0 }
 0x123   :  { %v477_v62 = vmul.f32 1.442695, %v399_v51  ;;  %v3017_v19 = vpop.eup %2229  ;;  %v479_v29 = vmul.f32 1.442695, %v400_v42 }
 0x124   :  { %v246_v30 = vpop.xlane.xlu1 %245  ;;  %v243_v47 = vpop.xlane.xlu0 %242  ;;  %v589_v25 = vsel %vm192_vm0, %v3017_v19, 0.0 }
 0x125   :  { %v402_v48 = vsub.f32 %v2732_v53, %v246_v30  ;;  %v401_v22 = vsub.f32 %v2735_v54, %v243_v47  ;;  %v3025_v34 = vpop.eup %2231  ;;  %2241 = vpow2.f32 %v477_v62  ;;  %611 = vadd.xlane.f32.xlu1 %v610_v8  ;;  %590 = vadd.xlane.f32.xlu0 %v589_v25 }
 0x126   :  { %2243 = vpow2.f32 %v479_v29  ;;  %v592_v4 = vsel %vm192_vm0, %v3025_v34, 0.0 }
 0x127   :  { %v481_v35 = vmul.f32 1.442695, %v401_v22  ;;  %v3027_v36 = vpop.eup %2233  ;;  %v483_v11 = vmul.f32 1.442695, %v402_v48 }
 0x128   :  { %v270_v12 = vpop.xlane.xlu1 %269  ;;  %v267_v53 = vpop.xlane.xlu0 %266  ;;  %v613_v18 = vsel %vm192_vm0, %v3027_v36, 0.0 }
 0x129   :  { %v410_v54 = vsub.f32 %v2742_v59, %v270_v12  ;;  %v409_v37 = vsub.f32 %v2745_v60, %v267_v53  ;;  %v3035_v63 = vpop.eup %2235  ;;  %2245 = vpow2.f32 %v481_v35  ;;  %593 = vadd.xlane.f32.xlu1 %v592_v4  ;;  %614 = vadd.xlane.f32.xlu0 %v613_v18 }
 0x12a   :  { %2247 = vpow2.f32 %v483_v11  ;;  %v616_v62 = vsel %vm192_vm0, %v3035_v63, 0.0 }
 0x12b   :  { %v497_v41 = vmul.f32 1.442695, %v409_v37  ;;  %v3037_v42 = vpop.eup %2237  ;;  %v499_v51 = vmul.f32 1.442695, %v410_v54 }
 0x12c   :  { %v252_v23 = vpop.xlane.xlu1 %251  ;;  %v249_v59 = vpop.xlane.xlu0 %248  ;;  %v595_v29 = vsel %vm192_vm0, %v3037_v42, 0.0 }
 0x12d   :  { %v404_v60 = vsub.f32 %v2752_v1, %v252_v23  ;;  %v403_v52 = vsub.f32 %v2755_v2, %v249_v59  ;;  %v3045_v30 = vpop.eup %2239  ;;  %2249 = vpow2.f32 %v497_v41  ;;  %617 = vadd.xlane.f32.xlu1 %v616_v62  ;;  %596 = vadd.xlane.f32.xlu0 %v595_v29 }
 0x12e   :  { %2251 = vpow2.f32 %v499_v51  ;;  %v598_v35 = vsel %vm192_vm0, %v3045_v30, 0.0 }
 0x12f   :  { %v485_v47 = vmul.f32 1.442695, %v403_v52  ;;  %v3047_v48 = vpop.eup %2241  ;;  %v487_v22 = vmul.f32 1.442695, %v404_v60 }
 0x130   :  { %v276_v8 = vpop.xlane.xlu1 %275  ;;  %v273_v1 = vpop.xlane.xlu0 %272  ;;  %v619_v11 = vsel %vm192_vm0, %v3047_v48, 0.0 }
 0x131   :  { %v412_v2 = vsub.f32 %v2762_v10, %v276_v8  ;;  %v411_v25 = vsub.f32 %v2765_v13, %v273_v1  ;;  %v3055_v12 = vpop.eup %2243  ;;  %2253 = vpow2.f32 %v485_v47  ;;  %599 = vadd.xlane.f32.xlu1 %v598_v35  ;;  %620 = vadd.xlane.f32.xlu0 %v619_v11 }
 0x132   :  { %2255 = vpow2.f32 %v487_v22  ;;  %v622_v41 = vsel %vm192_vm0, %v3055_v12, 0.0 }
 0x133   :  { %v501_v53 = vmul.f32 1.442695, %v411_v25  ;;  %v3057_v54 = vpop.eup %2245  ;;  %v503_v37 = vmul.f32 1.442695, %v412_v2 }
 0x134   :  { %v258_v4 = vpop.xlane.xlu1 %257  ;;  %v255_v10 = vpop.xlane.xlu0 %254  ;;  %v625_v51 = vsel %vm192_vm0, %v3057_v54, 0.0 }
 0x135   :  { %v406_v13 = vsub.f32 %v2772_v20, %v258_v4  ;;  %v405_v18 = vsub.f32 %v2775_v21, %v255_v10  ;;  %v3065_v23 = vpop.eup %2247  ;;  %2257 = vpow2.f32 %v501_v53  ;;  %623 = vadd.xlane.f32.xlu1 %v622_v41  ;;  %626 = vadd.xlane.f32.xlu0 %v625_v51  ;;  %v1185_v51 = vld [vmem:[#allocation9] sm:$0xff] }
 0x136   :  { %2259 = vpow2.f32 %v503_v37  ;;  %v628_v47 = vsel %vm192_vm0, %v3065_v23, 0.0 }
 0x137   :  { %v489_v59 = vmul.f32 1.442695, %v405_v18  ;;  %v3067_v60 = vpop.eup %2249  ;;  %v491_v52 = vmul.f32 1.442695, %v406_v13 }
 0x138   :  { %v282_v62 = vpop.xlane.xlu1 %281  ;;  %v279_v20 = vpop.xlane.xlu0 %278  ;;  %v649_v22 = vsel %vm192_vm0, %v3067_v60, 0.0 }
 0x139   :  { %v414_v21 = vsub.f32 %v2782_v28, %v282_v62  ;;  %v413_v29 = vsub.f32 %v2785_v31, %v279_v20  ;;  %v3075_v8 = vpop.eup %2251  ;;  %2261 = vpow2.f32 %v489_v59  ;;  %629 = vadd.xlane.f32.xlu1 %v628_v47  ;;  %650 = vadd.xlane.f32.xlu0 %v649_v22 }
 0x13a   :  { %2263 = vpow2.f32 %v491_v52  ;;  %v652_v53 = vsel %vm192_vm0, %v3075_v8, 0.0 }
 0x13b   :  { %v505_v1 = vmul.f32 1.442695, %v413_v29  ;;  %v3077_v2 = vpop.eup %2253  ;;  %v507_v25 = vmul.f32 1.442695, %v414_v21 }
 0x13c   :  { %v264_v35 = vpop.xlane.xlu1 %263  ;;  %v261_v28 = vpop.xlane.xlu0 %260  ;;  %v631_v37 = vsel %vm192_vm0, %v3077_v2, 0.0 }
 0x13d   :  { %v408_v31 = vsub.f32 %v2792_v38, %v264_v35  ;;  %v407_v11 = vsub.f32 %v2795_v39, %v261_v28  ;;  %v3085_v4 = vpop.eup %2255  ;;  %2265 = vpow2.f32 %v505_v1  ;;  %653 = vadd.xlane.f32.xlu1 %v652_v53  ;;  %632 = vadd.xlane.f32.xlu0 %v631_v37  ;;  %v1186_v39 = vld [vmem:[#allocation9 + $0x8] sm:$0xff]  ;;  %v1188_v35 = vld [vmem:[#allocation9 + $0x18] sm:$0xff]  ;;  %v1193_v28 = vld [vmem:[#allocation9 + $0x40] sm:$0xff] }
 0x13e   :  { %2267 = vpow2.f32 %v507_v25  ;;  %v634_v62 = vsel %vm192_vm0, %v3085_v4, 0.0  ;;  %v1249_v29 = vpack.c.bf16 %v1186_v39, %v1185_v51 }
 0x13f   :  { %v493_v10 = vmul.f32 1.442695, %v407_v11  ;;  %v3087_v13 = vpop.eup %2257  ;;  %v495_v18 = vmul.f32 1.442695, %v408_v31 }
 0x140   :  { %v288_v41 = vpop.xlane.xlu1 %287  ;;  %v285_v38 = vpop.xlane.xlu0 %284  ;;  %v655_v20 = vsel %vm192_vm0, %v3087_v13, 0.0  ;;  %2075 = vmatprep.subr.bf16.mxu0 %v1249_v29 }
 0x141   :  { %v416_v59 = vsub.f32 %v2802_v46, %v288_v41  ;;  %v415_v52 = vsub.f32 %v2805_v49, %v285_v38  ;;  %v3095_v21 = vpop.eup %2259  ;;  %2269 = vpow2.f32 %v493_v10  ;;  %635 = vadd.xlane.f32.xlu1 %v634_v62  ;;  %656 = vadd.xlane.f32.xlu0 %v655_v20  ;;  %v1187_v49 = vld [vmem:[#allocation9 + $0x10] sm:$0xff]  ;;  %v1194_v10 = vld [vmem:[#allocation9 + $0x48] sm:$0xff] }
 0x142   :  { %2271 = vpow2.f32 %v495_v18  ;;  %v658_v53 = vsel %vm192_vm0, %v3095_v21, 0.0  ;;  %2076 = vmatpush3.bf16.msra.mxu0 %v1249_v29  ;;  %v1250_v41 = vpack.c.bf16 %v1188_v35, %v1187_v49  ;;  %v1253_v38 = vpack.c.bf16 %v1194_v10, %v1193_v28  ;;  %v1190_v62 = vld [vmem:[#allocation9 + $0x28] sm:$0xff]  ;;  %v1192_v10 = vld [vmem:[#allocation9 + $0x38] sm:$0xff] }
 0x143   :  { %v509_v47 = vmul.f32 1.442695, %v415_v52  ;;  %v3097_v22 = vpop.eup %2261  ;;  %v511_v1 = vmul.f32 1.442695, %v416_v59  ;;  %v1189_v52 = vld [vmem:[#allocation9 + $0x20] sm:$0xff] }
 0x144   :  { %v294_v46 = vpop.xlane.xlu1 %293  ;;  %v291_v25 = vpop.xlane.xlu0 %290  ;;  %v637_v37 = vsel %vm192_vm0, %v3097_v22, 0.0  ;;  %2077 = vmatprep.subr.bf16.mxu0 %v1250_v41  ;;  %2091 = vmatprep.subr.bf16.mxu1 %v1253_v38  ;;  %v1251_v35 = vpack.c.bf16 %v1190_v62, %v1189_v52 }
 0x145   :  { %v418_v31 = vsub.f32 %v2812_v56, %v294_v46  ;;  %v417_v11 = vsub.f32 %v2815_v57, %v291_v25  ;;  %v3105_v18 = vpop.eup %2263  ;;  %2273 = vpow2.f32 %v509_v47  ;;  %659 = vadd.xlane.f32.xlu1 %v658_v53  ;;  %638 = vadd.xlane.f32.xlu0 %v637_v37  ;;  %v1196_v25 = vld [vmem:[#allocation9 + $0x58] sm:$0xff]  ;;  %v1191_v37 = vld [vmem:[#allocation9 + $0x30] sm:$0xff] }
 0x146   :  { %2275 = vpow2.f32 %v511_v1  ;;  %v640_v47 = vsel %vm192_vm0, %v3105_v18, 0.0  ;;  %2078 = vmatpush3.bf16.msra.mxu0 %v1250_v41  ;;  %2092 = vmatpush3.bf16.msra.mxu1 %v1253_v38  ;;  %v1195_v1 = vld [vmem:[#allocation9 + $0x50] sm:$0xff]  ;;  %v1252_v62 = vpack.c.bf16 %v1192_v10, %v1191_v37 }
 0x147   :  { %v513_v51 = vmul.f32 1.442695, %v417_v11  ;;  %v3107_v39 = vpop.eup %2265  ;;  %v515_v56 = vmul.f32 1.442695, %v418_v31  ;;  %2079 = vmatprep.subr.bf16.mxu0 %v1251_v35 }
 0x148   :  { %v318_v57 = vpop.xlane.xlu1 %317  ;;  %v315_v59 = vpop.xlane.xlu0 %314  ;;  %v661_v46 = vsel %vm192_vm0, %v3107_v39, 0.0 }
 0x149   :  { %v426_v20 = vsub.f32 %v2822_v0, %v318_v57  ;;  %v425_v29 = vsub.f32 %v2825_v3, %v315_v59  ;;  %v3115_v49 = vpop.eup %2267  ;;  %2277 = vpow2.f32 %v513_v51  ;;  %641 = vadd.xlane.f32.xlu1 %v640_v47  ;;  %662 = vadd.xlane.f32.xlu0 %v661_v46  ;;  %v1254_v0 = vpack.c.bf16 %v1196_v25, %v1195_v1  ;;  %v1197_v59 = vld [vmem:[#allocation9 + $0x60] sm:$0xff] }
 0x14a   :  { %2279 = vpow2.f32 %v515_v56  ;;  %v664_v51 = vsel %vm192_vm0, %v3115_v49, 0.0  ;;  %2080 = vmatpush3.bf16.msra.mxu0 %v1251_v35  ;;  %v1198_v56 = vld [vmem:[#allocation9 + $0x68] sm:$0xff] }
 0x14b   :  { %v529_v28 = vmul.f32 1.442695, %v425_v29  ;;  %v3117_v31 = vpop.eup %2269  ;;  %v531_v3 = vmul.f32 1.442695, %v426_v20  ;;  %2093 = vmatprep.subr.bf16.mxu1 %v1254_v0  ;;  %v1255_v20 = vpack.c.bf16 %v1198_v56, %v1197_v59  ;;  %2081 = vmatprep.subr.bf16.mxu0 %v1252_v62 }
 0x14c   :  { %v300_v11 = vpop.xlane.xlu1 %299  ;;  %v297_v53 = vpop.xlane.xlu0 %296  ;;  %v643_v57 = vsel %vm192_vm0, %v3117_v31, 0.0  ;;  %2094 = vmatpush3.bf16.msra.mxu1 %v1254_v0  ;;  %v1199_v0 = vld [vmem:[#allocation9 + $0x70] sm:$0xff] }
 0x14d   :  { %v420_v41 = vsub.f32 %v2832_v15, %v300_v11  ;;  %v419_v38 = vsub.f32 %v2835_v16, %v297_v53  ;;  %v3125_v52 = vpop.eup %2271  ;;  %2281 = vpow2.f32 %v529_v28  ;;  %665 = vadd.xlane.f32.xlu1 %v664_v51  ;;  %644 = vadd.xlane.f32.xlu0 %v643_v57  ;;  %v1200_v11 = vld [vmem:[#allocation9 + $0x78] sm:$0xff] }
 0x14e   :  { %2283 = vpow2.f32 %v531_v3  ;;  %2095 = vmatprep.subr.bf16.mxu1 %v1255_v20  ;;  %v646_v35 = vsel %vm192_vm0, %v3125_v52, 0.0  ;;  %2082 = vmatpush3.bf16.msra.mxu0 %v1252_v62  ;;  %v1256_v3 = vpack.c.bf16 %v1200_v11, %v1199_v0 }
 0x14f   :  { %v517_v15 = vmul.f32 1.442695, %v419_v38  ;;  %v3127_v16 = vpop.eup %2273  ;;  %v519_v29 = vmul.f32 1.442695, %v420_v41 }
 0x150   :  { %v324_v47 = vpop.xlane.xlu1 %323  ;;  %v321_v46 = vpop.xlane.xlu0 %320  ;;  %v667_v28 = vsel %vm192_vm0, %v3127_v16, 0.0  ;;  %2096 = vmatpush3.bf16.msra.mxu1 %v1255_v20 }
 0x151   :  { %v428_v1 = vsub.f32 %v2842_v27, %v324_v47  ;;  %v427_v25 = vsub.f32 %v2845_v32, %v321_v46  ;;  %v3135_v53 = vpop.eup %2275  ;;  %2285 = vpow2.f32 %v517_v15  ;;  %647 = vadd.xlane.f32.xlu1 %v646_v35  ;;  %668 = vadd.xlane.f32.xlu0 %v667_v28 }
 0x152   :  { %2287 = vpow2.f32 %v519_v29  ;;  %2097 = vmatprep.subr.bf16.mxu1 %v1256_v3  ;;  %v670_v57 = vsel %vm192_vm0, %v3135_v53, 0.0 }
 0x153   :  { %v533_v37 = vmul.f32 1.442695, %v427_v25  ;;  %v3137_v27 = vpop.eup %2277  ;;  %v535_v32 = vmul.f32 1.442695, %v428_v1 }
 0x154   :  { %v306_v10 = vpop.xlane.xlu1 %305  ;;  %v303_v41 = vpop.xlane.xlu0 %302  ;;  %v673_v59 = vsel %vm192_vm0, %v3137_v27, 0.0  ;;  %2098 = vmatpush3.bf16.msra.mxu1 %v1256_v3 }
 0x155   :  { %v422_v38 = vsub.f32 %v2852_v43, %v306_v10  ;;  %v421_v51 = vsub.f32 %v2855_v44, %v303_v41  ;;  %v3145_v56 = vpop.eup %2279  ;;  %2289 = vpow2.f32 %v533_v37  ;;  %671 = vadd.xlane.f32.xlu1 %v670_v57  ;;  %674 = vadd.xlane.f32.xlu0 %v673_v59  ;;  %v1201_v59 = vld [vmem:[#allocation9 + $0x80] sm:$0xff] }
 0x156   :  { %2291 = vpow2.f32 %v535_v32  ;;  %v676_v46 = vsel %vm192_vm0, %v3145_v56, 0.0 }
 0x157   :  { %v521_v62 = vmul.f32 1.442695, %v421_v51  ;;  %v3147_v20 = vpop.eup %2281  ;;  %v523_v15 = vmul.f32 1.442695, %v422_v38 }
 0x158   :  { %v330_v43 = vpop.xlane.xlu1 %329  ;;  %v327_v29 = vpop.xlane.xlu0 %326  ;;  %v697_v1 = vsel %vm192_vm0, %v3147_v20, 0.0 }
 0x159   :  { %v430_v44 = vsub.f32 %v2862_v55, %v330_v43  ;;  %v429_v47 = vsub.f32 %v2865_v58, %v327_v29  ;;  %v3155_v25 = vpop.eup %2283  ;;  %2293 = vpow2.f32 %v521_v62  ;;  %677 = vadd.xlane.f32.xlu1 %v676_v46  ;;  %698 = vadd.xlane.f32.xlu0 %v697_v1 }
 0x15a   :  { %2295 = vpow2.f32 %v523_v15  ;;  %v700_v37 = vsel %vm192_vm0, %v3155_v25, 0.0 }
 0x15b   :  { %v537_v35 = vmul.f32 1.442695, %v429_v47  ;;  %v3157_v28 = vpop.eup %2285  ;;  %v539_v0 = vmul.f32 1.442695, %v430_v44 }
 0x15c   :  { %v312_v11 = vpop.xlane.xlu1 %311  ;;  %v309_v55 = vpop.xlane.xlu0 %308  ;;  %v679_v32 = vsel %vm192_vm0, %v3157_v28, 0.0 }
 0x15d   :  { %v424_v58 = vsub.f32 %v2872_v6, %v312_v11  ;;  %v423_v3 = vsub.f32 %v2875_v9, %v309_v55  ;;  %v3165_v10 = vpop.eup %2287  ;;  %2297 = vpow2.f32 %v537_v35  ;;  %701 = vadd.xlane.f32.xlu1 %v700_v37  ;;  %680 = vadd.xlane.f32.xlu0 %v679_v32  ;;  %v1202_v9 = vld [vmem:[#allocation9 + $0x88] sm:$0xff]  ;;  %v3593_v11 = vld [vmem:[#allocation14_spill] sm:$0xff] }
 0x15e   :  { %2299 = vpow2.f32 %v539_v0  ;;  %v682_v43 = vsel %vm192_vm0, %v3165_v10, 0.0  ;;  %v3177_v47 = vpack.c.bf16 %v1202_v9, %v1201_v59  ;;  %v1209_v37 = vld [vmem:[#allocation9 + $0xc0] sm:$0xff]  ;;  %v1210_v32 = vld [vmem:[#allocation9 + $0xc8] sm:$0xff] }
 0x15f   :  { %v525_v41 = vmul.f32 1.442695, %v423_v3  ;;  %v3167_v38 = vpop.eup %2289  ;;  %v527_v51 = vmul.f32 1.442695, %v424_v58 }
 0x160   :  { %v336_v57 = vpop.xlane.xlu1 %335  ;;  %v333_v6 = vpop.xlane.xlu0 %332  ;;  %v703_v29 = vsel %vm192_vm0, %v3167_v38, 0.0  ;;  %2107 = vmatprep.subr.bf16.mxu0 %v3177_v47 }
 0x161   :  { %v432_v62 = vsub.f32 %v2882_v26, %v336_v57  ;;  %v431_v15 = vsub.f32 %v2885_v33, %v333_v6  ;;  %v3175_v44 = vpop.eup %2291  ;;  %2301 = vpow2.f32 %v525_v41  ;;  %683 = vadd.xlane.f32.xlu1 %v682_v43  ;;  %704 = vadd.xlane.f32.xlu0 %v703_v29  ;;  %v3597_v43 = vld [vmem:[#allocation16_spill] sm:$0xff] }
 0x162   :  { %2303 = vpow2.f32 %v527_v51  ;;  %v706_v58 = vsel %vm192_vm0, %v3175_v44, 0.0  ;;  %v3190_v51 = vpack.c.bf16 %v1210_v32, %v1209_v37  ;;  %v3601_v32 = vld [vmem:[#allocation18_spill] sm:$0xff] }
 0x163   :  { %v541_v46 = vmul.f32 1.442695, %v431_v15  ;;  %v3179_v1 = vpop.eup %2293  ;;  %v543_v26 = vmul.f32 1.442695, %v432_v62  ;;  %v3596_v62 = vld [vmem:[#allocation15_spill] sm:$0xff] }
 0x164   :  { %v342_v35 = vpop.xlane.xlu1 %341  ;;  %v339_v33 = vpop.xlane.xlu0 %338  ;;  %v685_v3 = vsel %vm192_vm0, %v3179_v1, 0.0  ;;  %2123 = vmatprep.subr.bf16.mxu1 %v3190_v51 }
 0x165   :  { %v434_v0 = vsub.f32 %v2892_v50, %v342_v35  ;;  %v433_v55 = vsub.f32 %v3593_v11, %v339_v33  ;;  %v3188_v41 = vpop.eup %2295  ;;  %2305 = vpow2.f32 %v541_v46  ;;  %707 = vadd.xlane.f32.xlu1 %v706_v58  ;;  %686 = vadd.xlane.f32.xlu0 %v685_v3  ;;  %v3600_v3 = vld [vmem:[#allocation17_spill] sm:$0xff] }
 0x166   :  { %3594 = vst [vmem:[#allocation14_spill] sm:$0xff] %v3188_v41  ;;  %2307 = vpow2.f32 %v543_v26  ;;  %v688_v46 = vsel %vm192_vm0, %v3188_v41, 0.0  ;;  %v1212_v41 = vld [vmem:[#allocation9 + $0xd8] sm:$0xff] }
 0x167   :  { %v545_v57 = vmul.f32 1.442695, %v433_v55  ;;  %v3192_v6 = vpop.eup %2297  ;;  %v547_v50 = vmul.f32 1.442695, %v434_v0 }
 0x168   :  { %3595 = vst [vmem:[#allocation29_spill] sm:$0xff] %v3192_v6  ;;  %v366_v59 = vpop.xlane.xlu1 %365  ;;  %v363_v9 = vpop.xlane.xlu0 %362  ;;  %v709_v35 = vsel %vm192_vm0, %v3192_v6, 0.0 }
 0x169   :  { %v442_v15 = vsub.f32 %v3596_v62, %v366_v59  ;;  %v441_v29 = vsub.f32 %v3597_v43, %v363_v9  ;;  %v3201_v33 = vpop.eup %2299  ;;  %2309 = vpow2.f32 %v545_v57  ;;  %689 = vadd.xlane.f32.xlu1 %v688_v46  ;;  %710 = vadd.xlane.f32.xlu0 %v709_v35  ;;  %v3604_v35 = vld [vmem:[#allocation19_spill] sm:$0xff] }
 0x16a   :  { %3598 = vst [vmem:[#allocation15_spill] sm:$0xff] %v3201_v33  ;;  %2311 = vpow2.f32 %v547_v50  ;;  %v712_v9 = vsel %vm192_vm0, %v3201_v33, 0.0 }
 0x16b   :  { %v561_v26 = vmul.f32 1.442695, %v441_v29  ;;  %v3203_v0 = vpop.eup %2301  ;;  %v563_v11 = vmul.f32 1.442695, %v442_v15 }
 0x16c   :  { %3599 = vst [vmem:[#allocation16_spill] sm:$0xff] %v3203_v0  ;;  %v348_v55 = vpop.xlane.xlu1 %347  ;;  %v345_v58 = vpop.xlane.xlu0 %344  ;;  %v691_v62 = vsel %vm192_vm0, %v3203_v0, 0.0 }
 0x16d   :  { %v436_v37 = vsub.f32 %v3600_v3, %v348_v55  ;;  %v435_v59 = vsub.f32 %v3601_v32, %v345_v58  ;;  %v3211_v57 = vpop.eup %2303  ;;  %2313 = vpow2.f32 %v561_v26  ;;  %713 = vadd.xlane.f32.xlu1 %v712_v9  ;;  %692 = vadd.xlane.f32.xlu0 %v691_v62  ;;  %v3605_v58 = vld [vmem:[#allocation20_spill] sm:$0xff] }
 0x16e   :  { %3602 = vst [vmem:[#allocation17_spill] sm:$0xff] %v3211_v57  ;;  %2315 = vpow2.f32 %v563_v11  ;;  %v694_v32 = vsel %vm192_vm0, %v3211_v57, 0.0 }
 0x16f   :  { %v549_v43 = vmul.f32 1.442695, %v435_v59  ;;  %v3213_v50 = vpop.eup %2305  ;;  %v551_v15 = vmul.f32 1.442695, %v436_v37 }
 0x170   :  { %3603 = vst [vmem:[#allocation18_spill] sm:$0xff] %v3213_v50  ;;  %v372_v29 = vpop.xlane.xlu1 %371  ;;  %v369_v46 = vpop.xlane.xlu0 %368  ;;  %v715_v0 = vsel %vm192_vm0, %v3213_v50, 0.0 }
 0x171   :  { %v444_v55 = vsub.f32 %v3604_v35, %v372_v29  ;;  %v443_v3 = vsub.f32 %v3605_v58, %v369_v46  ;;  %v3221_v26 = vpop.eup %2307  ;;  %2317 = vpow2.f32 %v549_v43  ;;  %695 = vadd.xlane.f32.xlu1 %v694_v32  ;;  %716 = vadd.xlane.f32.xlu0 %v715_v0  ;;  %v3608_v29 = vld [vmem:[#allocation21_spill] sm:$0xff]  ;;  %v3609_v35 = vld [vmem:[#allocation22_spill] sm:$0xff] }
 0x172   :  { %3606 = vst [vmem:[#allocation19_spill] sm:$0xff] %v3221_v26  ;;  %2319 = vpow2.f32 %v551_v15  ;;  %v718_v57 = vsel %vm192_vm0, %v3221_v26, 0.0 }
 0x173   :  { %v565_v59 = vmul.f32 1.442695, %v443_v3  ;;  %v3223_v11 = vpop.eup %2309  ;;  %v567_v37 = vmul.f32 1.442695, %v444_v55 }
 0x174   :  { %3607 = vst [vmem:[#allocation20_spill] sm:$0xff] %v3223_v11  ;;  %v354_v9 = vpop.xlane.xlu1 %353  ;;  %v351_v62 = vpop.xlane.xlu0 %350  ;;  %v721_v50 = vsel %vm192_vm0, %v3223_v11, 0.0 }
 0x175   :  { %v438_v46 = vsub.f32 %v3608_v29, %v354_v9  ;;  %v437_v58 = vsub.f32 %v3609_v35, %v351_v62  ;;  %v3231_v43 = vpop.eup %2311  ;;  %2321 = vpow2.f32 %v565_v59  ;;  %719 = vadd.xlane.f32.xlu1 %v718_v57  ;;  %722 = vadd.xlane.f32.xlu0 %v721_v50  ;;  %v3612_v9 = vld [vmem:[#allocation23_spill] sm:$0xff]  ;;  %v3613_v29 = vld [vmem:[#allocation24_spill] sm:$0xff] }
 0x176   :  { %3610 = vst [vmem:[#allocation21_spill] sm:$0xff] %v3231_v43  ;;  %2323 = vpow2.f32 %v567_v37  ;;  %v724_v26 = vsel %vm192_vm0, %v3231_v43, 0.0 }
 0x177   :  { %v553_v0 = vmul.f32 1.442695, %v437_v58  ;;  %v3233_v15 = vpop.eup %2313  ;;  %v555_v55 = vmul.f32 1.442695, %v438_v46 }
 0x178   :  { %3611 = vst [vmem:[#allocation22_spill] sm:$0xff] %v3233_v15  ;;  %v378_v3 = vpop.xlane.xlu1 %377  ;;  %v375_v32 = vpop.xlane.xlu0 %374  ;;  %v745_v11 = vsel %vm192_vm0, %v3233_v15, 0.0 }
 0x179   :  { %v446_v62 = vsub.f32 %v3612_v9, %v378_v3  ;;  %v445_v35 = vsub.f32 %v3613_v29, %v375_v32  ;;  %v3241_v59 = vpop.eup %2315  ;;  %2325 = vpow2.f32 %v553_v0  ;;  %725 = vadd.xlane.f32.xlu1 %v724_v26  ;;  %746 = vadd.xlane.f32.xlu0 %v745_v11  ;;  %v3616_v3 = vld [vmem:[#allocation25_spill] sm:$0xff]  ;;  %v3617_v9 = vld [vmem:[#allocation26_spill] sm:$0xff] }
 0x17a   :  { %3614 = vst [vmem:[#allocation23_spill] sm:$0xff] %v3241_v59  ;;  %2327 = vpow2.f32 %v555_v55  ;;  %v748_v43 = vsel %vm192_vm0, %v3241_v59, 0.0 }
 0x17b   :  { %v569_v57 = vmul.f32 1.442695, %v445_v35  ;;  %v3243_v50 = vpop.eup %2317  ;;  %v571_v37 = vmul.f32 1.442695, %v446_v62 }
 0x17c   :  { %3615 = vst [vmem:[#allocation24_spill] sm:$0xff] %v3243_v50  ;;  %v360_v46 = vpop.xlane.xlu1 %359  ;;  %v357_v58 = vpop.xlane.xlu0 %356  ;;  %v727_v15 = vsel %vm192_vm0, %v3243_v50, 0.0 }
 0x17d   :  { %v440_v32 = vsub.f32 %v3616_v3, %v360_v46  ;;  %v439_v29 = vsub.f32 %v3617_v9, %v357_v58  ;;  %v3251_v0 = vpop.eup %2319  ;;  %2329 = vpow2.f32 %v569_v57  ;;  %749 = vadd.xlane.f32.xlu1 %v748_v43  ;;  %728 = vadd.xlane.f32.xlu0 %v727_v15  ;;  %v3620_v46 = vld [vmem:[#allocation27_spill] sm:$0xff]  ;;  %v3621_v3 = vld [vmem:[#allocation28_spill] sm:$0xff] }
 0x17e   :  { %3618 = vst [vmem:[#allocation25_spill] sm:$0xff] %v3251_v0  ;;  %2331 = vpow2.f32 %v571_v37  ;;  %v730_v59 = vsel %vm192_vm0, %v3251_v0, 0.0 }
 0x17f   :  { %v557_v26 = vmul.f32 1.442695, %v439_v29  ;;  %v3253_v11 = vpop.eup %2321  ;;  %v559_v55 = vmul.f32 1.442695, %v440_v32 }
 0x180   :  { %3619 = vst [vmem:[#allocation26_spill] sm:$0xff] %v3253_v11  ;;  %v384_v62 = vpop.xlane.xlu1 %383  ;;  %v381_v35 = vpop.xlane.xlu0 %380  ;;  %v751_v50 = vsel %vm192_vm0, %v3253_v11, 0.0  ;;  %v899_v11 = vld [vmem:[#allocation7 + $0x10] sm:$0xff] }
 0x181   :  { %v448_v58 = vsub.f32 %v3620_v46, %v384_v62  ;;  %v447_v9 = vsub.f32 %v3621_v3, %v381_v35  ;;  %v3261_v57 = vpop.eup %2323  ;;  %2333 = vpow2.f32 %v557_v26  ;;  %731 = vadd.xlane.f32.xlu1 %v730_v59  ;;  %752 = vadd.xlane.f32.xlu0 %v751_v50  ;;  %vm963_vm5 = vcmp.ge.u32.totalorder %v899_v11, 429496729 }
 0x182   :  { %3622 = vst [vmem:[#allocation27_spill] sm:$0xff] %v3261_v57  ;;  %2335 = vpow2.f32 %v559_v55  ;;  %v754_v32 = vsel %vm192_vm0, %v3261_v57, 0.0 }
 0x183   :  { %v573_v43 = vmul.f32 1.442695, %v447_v9  ;;  %v3263_v15 = vpop.eup %2325  ;;  %v575_v37 = vmul.f32 1.442695, %v448_v58 }
 0x184   :  { %3623 = vst [vmem:[#allocation28_spill] sm:$0xff] %v3263_v15  ;;  %v733_v29 = vsel %vm192_vm0, %v3263_v15, 0.0  ;;  %v3269_v62 = vpop.eup %2327 }
 0x185   :  { %3624 = vst [vmem:[#allocation30_spill] sm:$0xff] %v3269_v62  ;;  %2337 = vpow2.f32 %v573_v43  ;;  %755 = vadd.xlane.f32.xlu1 %v754_v32  ;;  %734 = vadd.xlane.f32.xlu0 %v733_v29  ;;  %v736_v59 = vsel %vm192_vm0, %v3269_v62, 0.0 }
 0x186   :  { %2339 = vpow2.f32 %v575_v37 }
 0x187   :  { %v3271_v35 = vpop.eup %2329 }
 0x188   :  { %3625 = vst [vmem:[#allocation31_spill] sm:$0xff] %v3271_v35  ;;  %v757_v50 = vsel %vm192_vm0, %v3271_v35, 0.0  ;;  %v3277_v26 = vpop.eup %2331 }
 0x189   :  { %3626 = vst [vmem:[#allocation32_spill] sm:$0xff] %v3277_v26  ;;  %737 = vadd.xlane.f32.xlu1 %v736_v59  ;;  %758 = vadd.xlane.f32.xlu0 %v757_v50  ;;  %v760_v46 = vsel %vm192_vm0, %v3277_v26, 0.0 }
 0x18b   :  { %v3279_v55 = vpop.eup %2333 }
 0x18c   :  { %3627 = vst [vmem:[#allocation33_spill] sm:$0xff] %v3279_v55  ;;  %v739_v58 = vsel %vm192_vm0, %v3279_v55, 0.0  ;;  %v3285_v3 = vpop.eup %2335 }
 0x18d   :  { %3628 = vst [vmem:[#allocation34_spill] sm:$0xff] %v3285_v3  ;;  %761 = vadd.xlane.f32.xlu1 %v760_v46  ;;  %740 = vadd.xlane.f32.xlu0 %v739_v58  ;;  %v742_v43 = vsel %vm192_vm0, %v3285_v3, 0.0 }
 0x18f   :  { %v3287_v9 = vpop.eup %2337 }
 0x190   :  { %3629 = vst [vmem:[#allocation35_spill] sm:$0xff] %v3287_v9  ;;  %v763_v37 = vsel %vm192_vm0, %v3287_v9, 0.0  ;;  %v3293_v32 = vpop.eup %2339 }
 0x191   :  { %3630 = vst [vmem:[#allocation36_spill] sm:$0xff] %v3293_v32  ;;  %743 = vadd.xlane.f32.xlu1 %v742_v43  ;;  %764 = vadd.xlane.f32.xlu0 %v763_v37  ;;  %v766_v29 = vsel %vm192_vm0, %v3293_v32, 0.0  ;;  %v897_v43 = vld [vmem:[#allocation7] sm:$0xff]  ;;  %v898_v37 = vld [vmem:[#allocation7 + $0x8] sm:$0xff] }
 0x192   :  { %vm961_vm1 = vcmp.ge.u32.totalorder %v897_v43, 429496729  ;;  %vm962_vm2 = vcmp.ge.u32.totalorder %v898_v37, 429496729  ;;  %v900_v43 = vld [vmem:[#allocation7 + $0x18] sm:$0xff] }
 0x193   :  { %vm964_vm6 = vcmp.ge.u32.totalorder %v900_v43, 429496729  ;;  %v909_v43 = vld [vmem:[#allocation7 + $0x60] sm:$0xff] }
 0x194   :  { %vm973_vm11 = vcmp.ge.u32.totalorder %v909_v43, 429496729 }
 0x195   :  { %767 = vadd.xlane.f32.xlu1 %v766_v29 }
 0x1a2   :  { %v579_v59 = vpop.xlane.xlu0 %578 }
 0x1a3   :  { %2341 = vrcp.f32 %v579_v59 }
 0x1a6   :  { %v582_v50 = vpop.xlane.xlu1 %581  ;;  %v603_v46 = vpop.xlane.xlu0 %602 }
 0x1a7   :  { %2343 = vrcp.f32 %v582_v50 }
 0x1a8   :  { %2345 = vrcp.f32 %v603_v46  ;;  %v905_v46 = vld [vmem:[#allocation7 + $0x40] sm:$0xff] }
 0x1a9   :  { %vm969_vm3 = vcmp.ge.u32.totalorder %v905_v46, 429496729 }
 0x1aa   :  { %v606_v58 = vpop.xlane.xlu1 %605  ;;  %v585_v55 = vpop.xlane.xlu0 %584 }
 0x1ab   :  { %2347 = vrcp.f32 %v606_v58 }
 0x1ac   :  { %2349 = vrcp.f32 %v585_v55 }
 0x1ad   :  { %v2342_v3 = vpop.eup %2341 }
 0x1ae   :  { %v770_v9 = vmul.f32 1.1111112, %v2342_v3  ;;  %v588_v26 = vpop.xlane.xlu1 %587  ;;  %v609_v35 = vpop.xlane.xlu0 %608  ;;  %v906_v3 = vld [vmem:[#allocation7 + $0x48] sm:$0xff] }
 0x1af   :  { %2351 = vrcp.f32 %v588_v26  ;;  %vm970_vm4 = vcmp.ge.u32.totalorder %v906_v3, 429496729  ;;  %v1203_v3 = vld [vmem:[#allocation9 + $0x90] sm:$0xff] }
 0x1b0   :  { %2353 = vrcp.f32 %v609_v35  ;;  %v1025_v50 = vmul.f32 %v2979_v5, %v770_v9 }
 0x1b1   :  { %v2344_v32 = vpop.eup %2343 }
 0x1b2   :  { %v2346_v29 = vpop.eup %2345  ;;  %v772_v62 = vmul.f32 1.1111112, %v2344_v32  ;;  %v612_v59 = vpop.xlane.xlu1 %611  ;;  %v1089_v33 = vsel %vm961_vm1, %v1025_v50, 0.0  ;;  %v907_v50 = vld [vmem:[#allocation7 + $0x50] sm:$0xff] }
 0x1b3   :  { %v591_v15 = vpop.xlane.xlu0 %590  ;;  %v786_v57 = vmul.f32 1.1111112, %v2346_v29  ;;  %2355 = vrcp.f32 %v612_v59  ;;  %vm971_vm7 = vcmp.ge.u32.totalorder %v907_v50, 429496729  ;;  %v1213_v50 = vld [vmem:[#allocation9 + $0xe0] sm:$0xff] }
 0x1b4   :  { %2357 = vrcp.f32 %v591_v15  ;;  %v1026_v55 = vmul.f32 %v2987_v24, %v772_v62 }
 0x1b5   :  { %v2348_v26 = vpop.eup %2347  ;;  %v1033_v5 = vmul.f32 %v2985_v14, %v786_v57 }
 0x1b6   :  { %v2350_v35 = vpop.eup %2349  ;;  %v788_v58 = vmul.f32 1.1111112, %v2348_v26  ;;  %v594_v0 = vpop.xlane.xlu1 %593  ;;  %v1090_v6 = vsel %vm962_vm2, %v1026_v55, 0.0  ;;  %v908_v55 = vld [vmem:[#allocation7 + $0x58] sm:$0xff] }
 0x1b7   :  { %v615_v32 = vpop.xlane.xlu0 %614  ;;  %v774_v9 = vmul.f32 1.1111112, %v2350_v35  ;;  %2359 = vrcp.f32 %v594_v0  ;;  %v1153_v29 = vpack.c.bf16 %v1090_v6, %v1089_v33  ;;  %v1097_v0 = vsel %vm969_vm3, %v1033_v5, 0.0  ;;  %v1204_v35 = vld [vmem:[#allocation9 + $0x98] sm:$0xff] }
 0x1b8   :  { %2361 = vrcp.f32 %v615_v32  ;;  %v1034_v24 = vmul.f32 %v2995_v7, %v788_v58  ;;  %vm972_vm8 = vcmp.ge.u32.totalorder %v908_v55, 429496729  ;;  %v902_v32 = vld [vmem:[#allocation7 + $0x28] sm:$0xff] }
 0x1b9   :  { %v2352_v15 = vpop.eup %2351  ;;  %2083 = vmatprep.mubr.msk.bf16.mxu0 %vm192_vm0, %v1153_v29  ;;  %v1027_v37 = vmul.f32 %v2997_v40, %v774_v9  ;;  %v901_v40 = vld [vmem:[#allocation7 + $0x20] sm:$0xff]  ;;  %vm966_vm10 = vcmp.ge.u32.totalorder %v902_v32, 429496729  ;;  %v1214_v55 = vld [vmem:[#allocation9 + $0xe8] sm:$0xff] }
 0x1ba   :  { %v2354_v62 = vpop.eup %2353  ;;  %v776_v59 = vmul.f32 1.1111112, %v2352_v15  ;;  %v618_v26 = vpop.xlane.xlu1 %617  ;;  %v1098_v6 = vsel %vm970_vm4, %v1034_v24, 0.0  ;;  %vm965_vm9 = vcmp.ge.u32.totalorder %v901_v40, 429496729  ;;  %v1217_v32 = vld [vmem:[#allocation9 + $0x100] sm:$0xff] }
 0x1bb   :  { %v597_v14 = vpop.xlane.xlu0 %596  ;;  %v790_v33 = vmul.f32 1.1111112, %v2354_v62  ;;  %2363 = vrcp.f32 %v618_v26  ;;  %v1157_v57 = vpack.c.bf16 %v1098_v6, %v1097_v0  ;;  %v1091_v46 = vsel %vm963_vm5, %v1027_v37, 0.0  ;;  %v1205_v62 = vld [vmem:[#allocation9 + $0xa0] sm:$0xff]  ;;  %v910_v37 = vld [vmem:[#allocation7 + $0x68] sm:$0xff] }
 0x1bc   :  { %v1028_v7 = vmul.f32 %v3005_v45, %v776_v59  ;;  %2365 = vrcp.f32 %v597_v14  ;;  %v1206_v59 = vld [vmem:[#allocation9 + $0xa8] sm:$0xff]  ;;  %v1258_v0 = vpack.c.bf16 %v1204_v35, %v1203_v3  ;;  %vm974_vm12 = vcmp.ge.u32.totalorder %v910_v37, 429496729  ;;  %v1225_v37 = vld [vmem:[#allocation9 + $0x140] sm:$0xff] }
 0x1bd   :  { %v2356_v58 = vpop.eup %2355  ;;  %2099 = vmatprep.mubr.msk.bf16.mxu1 %vm192_vm0, %v1157_v57  ;;  %v1035_v29 = vmul.f32 %v3007_v17, %v790_v33  ;;  %v1211_v57 = vld [vmem:[#allocation9 + $0xd0] sm:$0xff]  ;;  %v1259_v17 = vpack.c.bf16 %v1206_v59, %v1205_v62  ;;  %v904_v59 = vld [vmem:[#allocation7 + $0x38] sm:$0xff] }
 0x1be   :  { %v2358_v9 = vpop.eup %2357  ;;  %v1092_v5 = vsel %vm964_vm6, %v1028_v7, 0.0  ;;  %v792_v24 = vmul.f32 1.1111112, %v2356_v58  ;;  %v600_v15 = vpop.xlane.xlu1 %599  ;;  %vm968_vm14 = vcmp.ge.u32.totalorder %v904_v59, 429496729  ;;  %v914_v59 = vld [vmem:[#allocation7 + $0x88] sm:$0xff] }
 0x1bf   :  { %v621_v45 = vpop.xlane.xlu0 %620  ;;  %v778_v26 = vmul.f32 1.1111112, %v2358_v9  ;;  %2367 = vrcp.f32 %v600_v15  ;;  %v1154_v14 = vpack.c.bf16 %v1092_v5, %v1091_v46  ;;  %v1099_v7 = vsel %vm971_vm7, %v1035_v29, 0.0  ;;  %v1207_v46 = vld [vmem:[#allocation9 + $0xb0] sm:$0xff]  ;;  %v1208_v5 = vld [vmem:[#allocation9 + $0xb8] sm:$0xff] }
 0x1c0   :  { %v1036_v6 = vmul.f32 %v3015_v61, %v792_v24  ;;  %2369 = vrcp.f32 %v621_v45  ;;  %v1262_v45 = vpack.c.bf16 %v1212_v41, %v1211_v57  ;;  %vm978_vm3 = vcmp.ge.u32.totalorder %v914_v59, 429496729  ;;  %v1220_v59 = vld [vmem:[#allocation9 + $0x118] sm:$0xff] }
 0x1c1   :  { %v2360_v11 = vpop.eup %2359  ;;  %2084 = vmatmul.mubr.msk.bf16.vlgmr.msra.gmra.mrb[0].mxu0 %vm192_vm0, %v1154_v14  ;;  %v1029_v3 = vmul.f32 %v3017_v19, %v778_v26  ;;  %v903_v19 = vld [vmem:[#allocation7 + $0x30] sm:$0xff] }
 0x1c2   :  { %v2362_v33 = vpop.eup %2361  ;;  %v1100_v58 = vsel %vm972_vm8, %v1036_v6, 0.0  ;;  %v780_v35 = vmul.f32 1.1111112, %v2360_v11  ;;  %v624_v61 = vpop.xlane.xlu1 %623  ;;  %2108 = vmatpush3.bf16.msra.mxu0 %v3177_v47  ;;  %v1260_v47 = vpack.c.bf16 %v1208_v5, %v1207_v46  ;;  %vm967_vm13 = vcmp.ge.u32.totalorder %v903_v19, 429496729 }
 0x1c3   :  { %v627_v9 = vpop.xlane.xlu0 %626  ;;  %v794_v24 = vmul.f32 1.1111112, %v2362_v33  ;;  %2371 = vrcp.f32 %v624_v61  ;;  %v1158_v15 = vpack.c.bf16 %v1100_v58, %v1099_v7  ;;  %2109 = vmatprep.subr.bf16.mxu0 %v1258_v0  ;;  %v1093_v14 = vsel %vm965_vm9, %v1029_v3, 0.0  ;;  %v1215_v33 = vld [vmem:[#allocation9 + $0xf0] sm:$0xff]  ;;  %v1216_v7 = vld [vmem:[#allocation9 + $0xf8] sm:$0xff]  ;;  %v1218_v3 = vld [vmem:[#allocation9 + $0x108] sm:$0xff] }
 0x1c4   :  { %v1030_v62 = vmul.f32 %v3025_v34, %v780_v35  ;;  %2373 = vrcp.f32 %v627_v9  ;;  %v1263_v61 = vpack.c.bf16 %v1214_v55, %v1213_v50 }
 0x1c5   :  { %v2364_v29 = vpop.eup %2363  ;;  %2100 = vmatmul.mubr.msk.bf16.vlgmr.msra.gmra.mrb[0].mxu1 %vm192_vm0, %v1158_v15  ;;  %v1037_v41 = vmul.f32 %v3027_v36, %v794_v24  ;;  %v911_v15 = vld [vmem:[#allocation7 + $0x70] sm:$0xff] }
 0x1c6   :  { %v2366_v26 = vpop.eup %2365  ;;  %v1094_v6 = vsel %vm966_vm10, %v1030_v62, 0.0  ;;  %v796_v57 = vmul.f32 1.1111112, %v2364_v29  ;;  %v630_v34 = vpop.xlane.xlu1 %629  ;;  %2110 = vmatpush3.bf16.msra.mxu0 %v1258_v0  ;;  %2124 = vmatpush3.bf16.msra.mxu1 %v3190_v51  ;;  %v1264_v0 = vpack.c.bf16 %v1216_v7, %v1215_v33  ;;  %v912_v62 = vld [vmem:[#allocation7 + $0x78] sm:$0xff]  ;;  %vm975_vm15 = vcmp.ge.u32.totalorder %v911_v15, 429496729 }
 0x1c7   :  { %v651_v11 = vpop.xlane.xlu0 %650  ;;  %v782_v58 = vmul.f32 1.1111112, %v2366_v26  ;;  %2375 = vrcp.f32 %v630_v34  ;;  %v1155_v35 = vpack.c.bf16 %v1094_v6, %v1093_v14  ;;  %2111 = vmatprep.subr.bf16.mxu0 %v1259_v17  ;;  %2125 = vmatprep.subr.bf16.mxu1 %v1262_v45  ;;  %v1101_v9 = vsel %vm973_vm11, %v1037_v41, 0.0  ;;  %v1226_v14 = vld [vmem:[#allocation9 + $0x148] sm:$0xff]  ;;  %v913_v34 = vld [vmem:[#allocation7 + $0x80] sm:$0xff] }
 0x1c8   :  { %v1038_v40 = vmul.f32 %v3035_v63, %v796_v57  ;;  %2377 = vrcp.f32 %v651_v11  ;;  %v3326_v26 = vpack.c.bf16 %v1218_v3, %v1217_v32  ;;  %vm976_vm1 = vcmp.ge.u32.totalorder %v912_v62, 429496729  ;;  %v921_v3 = vld [vmem:[#allocation7 + $0xc0] sm:$0xff] }
 0x1c9   :  { %v2368_v36 = vpop.eup %2367  ;;  %2087 = vmatprep.mubr.msk.bf16.mxu0 %vm192_vm0, %v1155_v35  ;;  %v1031_v5 = vmul.f32 %v3037_v42, %v782_v58  ;;  %v3334_v58 = vpack.c.bf16 %v1226_v14, %v1225_v37  ;;  %vm977_vm2 = vcmp.ge.u32.totalorder %v913_v34, 429496729  ;;  %vm985_vm4 = vcmp.ge.u32.totalorder %v921_v3, 429496729  ;;  %v916_v14 = vld [vmem:[#allocation7 + $0x98] sm:$0xff] }
 0x1ca   :  { %v2370_v51 = vpop.eup %2369  ;;  %v1102_v46 = vsel %vm974_vm12, %v1038_v40, 0.0  ;;  %v784_v24 = vmul.f32 1.1111112, %v2368_v36  ;;  %v654_v63 = vpop.xlane.xlu1 %653  ;;  %2112 = vmatpush3.bf16.msra.mxu0 %v1259_v17  ;;  %2126 = vmatpush3.bf16.msra.mxu1 %v1262_v45  ;;  %v924_v34 = vld [vmem:[#allocation7 + $0xd8] sm:$0xff]  ;;  %vm980_vm7 = vcmp.ge.u32.totalorder %v916_v14, 429496729 }
 0x1cb   :  { %v633_v50 = vpop.xlane.xlu0 %632  ;;  %v798_v55 = vmul.f32 1.1111112, %v2370_v51  ;;  %2379 = vrcp.f32 %v654_v63  ;;  %v1159_v29 = vpack.c.bf16 %v1102_v46, %v1101_v9  ;;  %2113 = vmatprep.subr.bf16.mxu0 %v1260_v47  ;;  %2127 = vmatprep.subr.bf16.mxu1 %v1263_v61  ;;  %v1095_v17 = vsel %vm967_vm13, %v1031_v5, 0.0  ;;  %v922_v5 = vld [vmem:[#allocation7 + $0xc8] sm:$0xff]  ;;  %v1223_v14 = vld [vmem:[#allocation9 + $0x130] sm:$0xff] }
 0x1cc   :  { %v1032_v43 = vmul.f32 %v3045_v30, %v784_v24  ;;  %2381 = vrcp.f32 %v633_v50  ;;  %v915_v50 = vld [vmem:[#allocation7 + $0x90] sm:$0xff]  ;;  %vm986_vm5 = vcmp.ge.u32.totalorder %v922_v5, 429496729  ;;  %vm988_vm9 = vcmp.ge.u32.totalorder %v924_v34, 429496729 }
 0x1cd   :  { %v2372_v42 = vpop.eup %2371  ;;  %2103 = vmatprep.mubr.msk.bf16.mxu1 %vm192_vm0, %v1159_v29  ;;  %v1039_v41 = vmul.f32 %v3047_v48, %v798_v55  ;;  %vm979_vm6 = vcmp.ge.u32.totalorder %v915_v50, 429496729 }
 0x1ce   :  { %v2374_v6 = vpop.eup %2373  ;;  %v1096_v45 = vsel %vm968_vm14, %v1032_v43, 0.0  ;;  %v800_v57 = vmul.f32 1.1111112, %v2372_v42  ;;  %v636_v11 = vpop.xlane.xlu1 %635  ;;  %2114 = vmatpush3.bf16.msra.mxu0 %v1260_v47  ;;  %2128 = vmatpush3.bf16.msra.mxu1 %v1263_v61 }
 0x1cf   :  { %v657_v33 = vpop.xlane.xlu0 %656  ;;  %v802_v30 = vmul.f32 1.1111112, %v2374_v6  ;;  %2383 = vrcp.f32 %v636_v11  ;;  %v1156_v7 = vpack.c.bf16 %v1096_v45, %v1095_v17  ;;  %2129 = vmatprep.subr.bf16.mxu1 %v1264_v0  ;;  %2139 = vmatprep.subr.bf16.mxu0 %v3326_v26  ;;  %v1103_v47 = vsel %vm975_vm15, %v1039_v41, 0.0 }
 0x1d0   :  { %v1040_v19 = vmul.f32 %v3055_v12, %v800_v57  ;;  %2385 = vrcp.f32 %v657_v33  ;;  %v923_v57 = vld [vmem:[#allocation7 + $0xd0] sm:$0xff] }
 0x1d1   :  { %v2376_v35 = vpop.eup %2375  ;;  %2088 = vmatmul.mubr.msk.bf16.gmra.mrb[4].mxu0 %vm192_vm0, %v1156_v7  ;;  %v1041_v40 = vmul.f32 %v3057_v54, %v802_v30  ;;  %vm987_vm8 = vcmp.ge.u32.totalorder %v923_v57, 429496729  ;;  %v1230_v57 = vld [vmem:[#allocation9 + $0x168] sm:$0xff] }
 0x1d2   :  { %v2378_v48 = vpop.eup %2377  ;;  %v1104_v61 = vsel %vm976_vm1, %v1040_v19, 0.0  ;;  %v804_v32 = vmul.f32 1.1111112, %v2376_v35  ;;  %v660_v36 = vpop.xlane.xlu1 %659  ;;  %2130 = vmatpush3.bf16.msra.mxu1 %v1264_v0  ;;  %v1219_v19 = vld [vmem:[#allocation9 + $0x110] sm:$0xff] }
 0x1d3   :  { %v639_v51 = vpop.xlane.xlu0 %638  ;;  %v818_v12 = vmul.f32 1.1111112, %v2378_v48  ;;  %2387 = vrcp.f32 %v660_v36  ;;  %v1160_v9 = vpack.c.bf16 %v1104_v61, %v1103_v47  ;;  %2155 = vmatprep.subr.bf16.mxu1 %v3334_v58  ;;  %v1105_v15 = vsel %vm977_vm2, %v1041_v40, 0.0  ;;  %v917_v48 = vld [vmem:[#allocation7 + $0xa0] sm:$0xff]  ;;  %v918_v47 = vld [vmem:[#allocation7 + $0xa8] sm:$0xff] }
 0x1d4   :  { %v1042_v46 = vmul.f32 %v3065_v23, %v804_v32  ;;  %2389 = vrcp.f32 %v639_v51  ;;  %v1221_v51 = vld [vmem:[#allocation9 + $0x120] sm:$0xff]  ;;  %v1266_v5 = vpack.c.bf16 %v1220_v59, %v1219_v19  ;;  %vm981_vm10 = vcmp.ge.u32.totalorder %v917_v48, 429496729 }
 0x1d5   :  { %v2380_v24 = vpop.eup %2379  ;;  %2104 = vmatmul.mubr.msk.bf16.gmra.mrb[4].mxu1 %vm192_vm0, %v1160_v9  ;;  %v1049_v0 = vmul.f32 %v3067_v60, %v818_v12  ;;  %v1222_v12 = vld [vmem:[#allocation9 + $0x128] sm:$0xff]  ;;  %vm982_vm11 = vcmp.ge.u32.totalorder %v918_v47, 429496729  ;;  %v1233_v47 = vld [vmem:[#allocation9 + $0x180] sm:$0xff] }
 0x1d6   :  { %v2382_v54 = vpop.eup %2381  ;;  %v1106_v62 = vsel %vm978_vm3, %v1042_v46, 0.0  ;;  %v820_v63 = vmul.f32 1.1111112, %v2380_v24  ;;  %v642_v55 = vpop.xlane.xlu1 %641 }
 0x1d7   :  { %v663_v29 = vpop.xlane.xlu0 %662  ;;  %v806_v43 = vmul.f32 1.1111112, %v2382_v54  ;;  %2391 = vrcp.f32 %v642_v55  ;;  %v1161_v23 = vpack.c.bf16 %v1106_v62, %v1105_v15  ;;  %v1113_v17 = vsel %vm985_vm4, %v1049_v0, 0.0  ;;  %v1227_v54 = vld [vmem:[#allocation9 + $0x150] sm:$0xff]  ;;  %v1228_v15 = vld [vmem:[#allocation9 + $0x158] sm:$0xff]  ;;  %v925_v0 = vld [vmem:[#allocation7 + $0xe0] sm:$0xff] }
 0x1d8   :  { %v1050_v37 = vmul.f32 %v3075_v8, %v820_v63  ;;  %2393 = vrcp.f32 %v663_v29  ;;  %v926_v63 = vld [vmem:[#allocation7 + $0xe8] sm:$0xff]  ;;  %vm989_vm12 = vcmp.ge.u32.totalorder %v925_v0, 429496729 }
 0x1d9   :  { %v2384_v42 = vpop.eup %2383  ;;  %2115 = vmatprep.mubr.msk.bf16.mxu0 %vm192_vm0, %v1161_v23  ;;  %v1043_v45 = vmul.f32 %v3077_v2, %v806_v43  ;;  %vm990_vm13 = vcmp.ge.u32.totalorder %v926_v63, 429496729  ;;  %v1241_v63 = vld [vmem:[#allocation9 + $0x1c0] sm:$0xff] }
 0x1da   :  { %v2386_v6 = vpop.eup %2385  ;;  %v1114_v60 = vsel %vm986_vm5, %v1050_v37, 0.0  ;;  %v808_v41 = vmul.f32 1.1111112, %v2384_v42  ;;  %v666_v11 = vpop.xlane.xlu1 %665  ;;  %v1224_v42 = vld [vmem:[#allocation9 + $0x138] sm:$0xff] }
 0x1db   :  { %v645_v33 = vpop.xlane.xlu0 %644  ;;  %v822_v30 = vmul.f32 1.1111112, %v2386_v6  ;;  %2395 = vrcp.f32 %v666_v11  ;;  %v1165_v8 = vpack.c.bf16 %v1114_v60, %v1113_v17  ;;  %v1107_v61 = vsel %vm979_vm6, %v1043_v45, 0.0  ;;  %v920_v11 = vld [vmem:[#allocation7 + $0xb8] sm:$0xff] }
 0x1dc   :  { %v1044_v7 = vmul.f32 %v3085_v4, %v808_v41  ;;  %2397 = vrcp.f32 %v645_v33  ;;  %v1270_v60 = vpack.c.bf16 %v1228_v15, %v1227_v54  ;;  %v1229_v41 = vld [vmem:[#allocation9 + $0x160] sm:$0xff]  ;;  %vm984_vm15 = vcmp.ge.u32.totalorder %v920_v11, 429496729 }
 0x1dd   :  { %v2388_v35 = vpop.eup %2387  ;;  %2131 = vmatprep.mubr.msk.bf16.mxu1 %vm192_vm0, %v1165_v8  ;;  %v1051_v32 = vmul.f32 %v3087_v13, %v822_v30  ;;  %v1267_v13 = vpack.c.bf16 %v1222_v12, %v1221_v51  ;;  %v937_v11 = vld [vmem:[#allocation7 + $0x140] sm:$0xff] }
 0x1de   :  { %v2390_v2 = vpop.eup %2389  ;;  %v1108_v40 = vsel %vm980_vm7, %v1044_v7, 0.0  ;;  %v824_v3 = vmul.f32 1.1111112, %v2388_v35  ;;  %v648_v36 = vpop.xlane.xlu1 %647  ;;  %v1231_v35 = vld [vmem:[#allocation9 + $0x170] sm:$0xff]  ;;  %vm1001_vm5 = vcmp.ge.u32.totalorder %v937_v11, 429496729 }
 0x1df   :  { %v669_v4 = vpop.xlane.xlu0 %668  ;;  %v1162_v9 = vpack.c.bf16 %v1108_v40, %v1107_v61  ;;  %v810_v46 = vmul.f32 1.1111112, %v2390_v2  ;;  %2399 = vrcp.f32 %v648_v36  ;;  %v1115_v55 = vsel %vm987_vm8, %v1051_v32, 0.0  ;;  %v1232_v2 = vld [vmem:[#allocation9 + $0x178] sm:$0xff] }
 0x1e0   :  { %v1052_v24 = vmul.f32 %v3095_v21, %v824_v3  ;;  %2401 = vrcp.f32 %v669_v4  ;;  %v1271_v32 = vpack.c.bf16 %v1230_v57, %v1229_v41  ;;  %v1234_v3 = vld [vmem:[#allocation9 + $0x188] sm:$0xff]  ;;  %v1272_v36 = vpack.c.bf16 %v1232_v2, %v1231_v35 }
 0x1e1   :  { %v2392_v62 = vpop.eup %2391  ;;  %2116 = vmatmul.mubr.msk.bf16.vlgmr.msra.gmra.mrb[8].mxu0 %vm192_vm0, %v1162_v9  ;;  %v1045_v43 = vmul.f32 %v3097_v22, %v810_v46  ;;  %v919_v22 = vld [vmem:[#allocation7 + $0xb0] sm:$0xff] }
 0x1e2   :  { %v2394_v50 = vpop.eup %2393  ;;  %v1116_v29 = vsel %vm988_vm9, %v1052_v24, 0.0  ;;  %v812_v23 = vmul.f32 1.1111112, %v2392_v62  ;;  %v672_v21 = vpop.xlane.xlu1 %671  ;;  %2140 = vmatpush3.bf16.msra.mxu0 %v3326_v26  ;;  %v1268_v26 = vpack.c.bf16 %v1224_v42, %v1223_v14  ;;  %vm983_vm14 = vcmp.ge.u32.totalorder %v919_v22, 429496729  ;;  %v927_v46 = vld [vmem:[#allocation7 + $0xf0] sm:$0xff] }
 0x1e3   :  { %v675_v37 = vpop.xlane.xlu0 %674  ;;  %v1166_v6 = vpack.c.bf16 %v1116_v29, %v1115_v55  ;;  %v826_v17 = vmul.f32 1.1111112, %v2394_v50  ;;  %2403 = vrcp.f32 %v672_v21  ;;  %2141 = vmatprep.subr.bf16.mxu0 %v1266_v5  ;;  %v1109_v30 = vsel %vm981_vm10, %v1045_v43, 0.0  ;;  %v1242_v50 = vld [vmem:[#allocation9 + $0x1c8] sm:$0xff]  ;;  %v929_v21 = vld [vmem:[#allocation7 + $0x100] sm:$0xff] }
 0x1e4   :  { %v1046_v45 = vmul.f32 %v3105_v18, %v812_v23  ;;  %2405 = vrcp.f32 %v675_v37  ;;  %v3372_v62 = vpack.c.bf16 %v1234_v3, %v1233_v47  ;;  %vm991_vm1 = vcmp.ge.u32.totalorder %v927_v46, 429496729  ;;  %v932_v3 = vld [vmem:[#allocation7 + $0x118] sm:$0xff] }
 0x1e5   :  { %v2396_v34 = vpop.eup %2395  ;;  %2132 = vmatmul.mubr.msk.bf16.vlgmr.msra.gmra.mrb[8].mxu1 %vm192_vm0, %v1166_v6  ;;  %v1053_v7 = vmul.f32 %v3107_v39, %v826_v17  ;;  %v3380_v6 = vpack.c.bf16 %v1242_v50, %v1241_v63  ;;  %vm993_vm3 = vcmp.ge.u32.totalorder %v929_v21, 429496729  ;;  %vm996_vm8 = vcmp.ge.u32.totalorder %v932_v3, 429496729  ;;  %v933_v63 = vld [vmem:[#allocation7 + $0x120] sm:$0xff]  ;;  %v934_v50 = vld [vmem:[#allocation7 + $0x128] sm:$0xff] }
 0x1e6   :  { %v2398_v33 = vpop.eup %2397  ;;  %v1110_v8 = vsel %vm982_vm11, %v1046_v45, 0.0  ;;  %v828_v19 = vmul.f32 1.1111112, %v2396_v34  ;;  %v678_v18 = vpop.xlane.xlu1 %677  ;;  %2142 = vmatpush3.bf16.msra.mxu0 %v1266_v5  ;;  %2156 = vmatpush3.bf16.msra.mxu1 %v3334_v58  ;;  %v928_v5 = vld [vmem:[#allocation7 + $0xf8] sm:$0xff]  ;;  %v1238_v21 = vld [vmem:[#allocation9 + $0x1a8] sm:$0xff] }
 0x1e7   :  { %v699_v59 = vpop.xlane.xlu0 %698  ;;  %v814_v61 = vmul.f32 1.1111112, %v2398_v33  ;;  %2407 = vrcp.f32 %v678_v18  ;;  %v1163_v40 = vpack.c.bf16 %v1110_v8, %v1109_v30  ;;  %2143 = vmatprep.subr.bf16.mxu0 %v1267_v13  ;;  %2157 = vmatprep.subr.bf16.mxu1 %v1270_v60  ;;  %v1117_v4 = vsel %vm989_vm12, %v1053_v7, 0.0  ;;  %v938_v7 = vld [vmem:[#allocation7 + $0x148] sm:$0xff]  ;;  %v936_v3 = vld [vmem:[#allocation7 + $0x138] sm:$0xff] }
 0x1e8   :  { %v1054_v48 = vmul.f32 %v3115_v49, %v828_v19  ;;  %2409 = vrcp.f32 %v699_v59  ;;  %vm992_vm2 = vcmp.ge.u32.totalorder %v928_v5, 429496729  ;;  %vm1002_vm6 = vcmp.ge.u32.totalorder %v938_v7, 429496729 }
 0x1e9   :  { %v2400_v39 = vpop.eup %2399  ;;  %2119 = vmatprep.mubr.msk.bf16.mxu0 %vm192_vm0, %v1163_v40  ;;  %v1047_v12 = vmul.f32 %v3117_v31, %v814_v61  ;;  %v931_v61 = vld [vmem:[#allocation7 + $0x110] sm:$0xff]  ;;  %vm997_vm11 = vcmp.ge.u32.totalorder %v933_v63, 429496729  ;;  %vm998_vm12 = vcmp.ge.u32.totalorder %v934_v50, 429496729 }
 0x1ea   :  { %v2402_v58 = vpop.eup %2401  ;;  %v1118_v51 = vsel %vm990_vm13, %v1054_v48, 0.0  ;;  %v816_v9 = vmul.f32 1.1111112, %v2400_v39  ;;  %v702_v49 = vpop.xlane.xlu1 %701  ;;  %2144 = vmatpush3.bf16.msra.mxu0 %v1267_v13  ;;  %2158 = vmatpush3.bf16.msra.mxu1 %v1270_v60  ;;  %v930_v60 = vld [vmem:[#allocation7 + $0x108] sm:$0xff]  ;;  %vm995_vm7 = vcmp.ge.u32.totalorder %v931_v61, 429496729 }
 0x1eb   :  { %v681_v24 = vpop.xlane.xlu0 %680  ;;  %v830_v54 = vmul.f32 1.1111112, %v2402_v58  ;;  %2411 = vrcp.f32 %v702_v49  ;;  %v1167_v15 = vpack.c.bf16 %v1118_v51, %v1117_v4  ;;  %2145 = vmatprep.subr.bf16.mxu0 %v1268_v26  ;;  %2159 = vmatprep.subr.bf16.mxu1 %v1271_v32  ;;  %v1111_v13 = vsel %vm983_vm14, %v1047_v12, 0.0  ;;  %v939_v12 = vld [vmem:[#allocation7 + $0x150] sm:$0xff] }
 0x1ec   :  { %v1048_v0 = vmul.f32 %v3125_v52, %v816_v9  ;;  %2413 = vrcp.f32 %v681_v24  ;;  %vm994_vm4 = vcmp.ge.u32.totalorder %v930_v60, 429496729  ;;  %v940_v9 = vld [vmem:[#allocation7 + $0x158] sm:$0xff]  ;;  %vm1003_vm9 = vcmp.ge.u32.totalorder %v939_v12, 429496729 }
 0x1ed   :  { %v2404_v31 = vpop.eup %2403  ;;  %2135 = vmatprep.mubr.msk.bf16.mxu1 %vm192_vm0, %v1167_v15  ;;  %v1055_v43 = vmul.f32 %v3127_v16, %v830_v54  ;;  %v1235_v54 = vld [vmem:[#allocation9 + $0x190] sm:$0xff]  ;;  %v1236_v15 = vld [vmem:[#allocation9 + $0x198] sm:$0xff]  ;;  %vm1004_vm10 = vcmp.ge.u32.totalorder %v940_v9, 429496729 }
 0x1ee   :  { %v2406_v55 = vpop.eup %2405  ;;  %v1112_v29 = vsel %vm984_vm15, %v1048_v0, 0.0  ;;  %v832_v23 = vmul.f32 1.1111112, %v2404_v31  ;;  %v684_v37 = vpop.xlane.xlu1 %683  ;;  %2146 = vmatpush3.bf16.msra.mxu0 %v1268_v26  ;;  %2160 = vmatpush3.bf16.msra.mxu1 %v1271_v32  ;;  %v1244_v60 = vld [vmem:[#allocation9 + $0x1d8] sm:$0xff]  ;;  %v1247_v9 = vld [vmem:[#allocation9 + $0x1f0] sm:$0xff] }
 0x1ef   :  { %v705_v14 = vpop.xlane.xlu0 %704  ;;  %v834_v52 = vmul.f32 1.1111112, %v2406_v55  ;;  %2415 = vrcp.f32 %v684_v37  ;;  %v1164_v42 = vpack.c.bf16 %v1112_v29, %v1111_v13  ;;  %2161 = vmatprep.subr.bf16.mxu1 %v1272_v36  ;;  %2171 = vmatprep.subr.bf16.mxu0 %v3372_v62  ;;  %v1119_v41 = vsel %vm991_vm1, %v1055_v43, 0.0 }
 0x1f0   :  { %v1056_v17 = vmul.f32 %v3135_v53, %v832_v23  ;;  %2417 = vrcp.f32 %v705_v14  ;;  %v1237_v23 = vld [vmem:[#allocation9 + $0x1a0] sm:$0xff]  ;;  %vm1000_vm1 = vcmp.ge.u32.totalorder %v936_v3, 429496729 }
 0x1f1   :  { %v2408_v45 = vpop.eup %2407  ;;  %2120 = vmatmul.mubr.msk.bf16.gmra.mrb[12].mxu0 %vm192_vm0, %v1164_v42  ;;  %v1057_v34 = vmul.f32 %v3137_v27, %v834_v52  ;;  %v1274_v52 = vpack.c.bf16 %v1236_v15, %v1235_v54 }
 0x1f2   :  { %v2410_v16 = vpop.eup %2409  ;;  %v1120_v57 = vsel %vm992_vm2, %v1056_v17, 0.0  ;;  %v836_v22 = vmul.f32 1.1111112, %v2408_v45  ;;  %v708_v26 = vpop.xlane.xlu1 %707  ;;  %2162 = vmatpush3.bf16.msra.mxu1 %v1272_v36  ;;  %v1243_v17 = vld [vmem:[#allocation9 + $0x1d0] sm:$0xff] }
 0x1f3   :  { %v687_v33 = vpop.xlane.xlu0 %686  ;;  %v850_v53 = vmul.f32 1.1111112, %v2410_v16  ;;  %2419 = vrcp.f32 %v708_v26  ;;  %v1168_v30 = vpack.c.bf16 %v1120_v57, %v1119_v41  ;;  %2187 = vmatprep.subr.bf16.mxu1 %v3380_v6  ;;  %v1121_v18 = vsel %vm993_vm3, %v1057_v34, 0.0  ;;  %v941_v16 = vld [vmem:[#allocation7 + $0x160] sm:$0xff]  ;;  %v942_v41 = vld [vmem:[#allocation7 + $0x168] sm:$0xff] }
 0x1f4   :  { %v1058_v8 = vmul.f32 %v3145_v56, %v836_v22  ;;  %2421 = vrcp.f32 %v687_v33  ;;  %vm1005_vm13 = vcmp.ge.u32.totalorder %v941_v16, 429496729  ;;  %vm1006_vm14 = vcmp.ge.u32.totalorder %v942_v41, 429496729 }
 0x1f5   :  { %v2412_v19 = vpop.eup %2411  ;;  %2136 = vmatmul.mubr.msk.bf16.gmra.mrb[12].mxu1 %vm192_vm0, %v1168_v30  ;;  %v1065_v35 = vmul.f32 %v3147_v20, %v850_v53  ;;  %v1239_v53 = vld [vmem:[#allocation9 + $0x1b0] sm:$0xff]  ;;  %v1240_v30 = vld [vmem:[#allocation9 + $0x1b8] sm:$0xff] }
 0x1f6   :  { %v2414_v27 = vpop.eup %2413  ;;  %v1122_v59 = vsel %vm994_vm4, %v1058_v8, 0.0  ;;  %v852_v2 = vmul.f32 1.1111112, %v2412_v19  ;;  %v690_v40 = vpop.xlane.xlu1 %689  ;;  %v1278_v19 = vpack.c.bf16 %v1244_v60, %v1243_v17  ;;  %v945_v17 = vld [vmem:[#allocation7 + $0x180] sm:$0xff] }
 0x1f7   :  { %v711_v32 = vpop.xlane.xlu0 %710  ;;  %v838_v48 = vmul.f32 1.1111112, %v2414_v27  ;;  %2423 = vrcp.f32 %v690_v40  ;;  %v1169_v56 = vpack.c.bf16 %v1122_v59, %v1121_v18  ;;  %v1129_v58 = vsel %vm1001_vm5, %v1065_v35, 0.0  ;;  %v3631_v27 = vld [vmem:[#allocation14_spill] sm:$0xff]  ;;  %v1246_v35 = vld [vmem:[#allocation9 + $0x1e8] sm:$0xff] }
 0x1f8   :  { %v1066_v47 = vmul.f32 %v3155_v25, %v852_v2  ;;  %2425 = vrcp.f32 %v711_v32  ;;  %v1245_v59 = vld [vmem:[#allocation9 + $0x1e0] sm:$0xff]  ;;  %v3632_v32 = vld [vmem:[#allocation29_spill] sm:$0xff]  ;;  %vm1009_vm4 = vcmp.ge.u32.totalorder %v945_v17, 429496729 }
 0x1f9   :  { %v2416_v39 = vpop.eup %2415  ;;  %2147 = vmatprep.mubr.msk.bf16.mxu0 %vm192_vm0, %v1169_v56  ;;  %v1059_v4 = vmul.f32 %v3157_v28, %v838_v48 }
 0x1fa   :  { %v2418_v36 = vpop.eup %2417  ;;  %v1130_v20 = vsel %vm1002_vm6, %v1066_v47, 0.0  ;;  %v840_v51 = vmul.f32 1.1111112, %v2416_v39  ;;  %v714_v46 = vpop.xlane.xlu1 %713  ;;  %v935_v47 = vld [vmem:[#allocation7 + $0x130] sm:$0xff] }
 0x1fb   :  { %v693_v5 = vpop.xlane.xlu0 %692  ;;  %v854_v49 = vmul.f32 1.1111112, %v2418_v36  ;;  %2427 = vrcp.f32 %v714_v46  ;;  %v1173_v25 = vpack.c.bf16 %v1130_v20, %v1129_v58  ;;  %v1123_v31 = vsel %vm995_vm7, %v1059_v4, 0.0  ;;  %v1248_v46 = vld [vmem:[#allocation9 + $0x1f8] sm:$0xff] }
 0x1fc   :  { %v1060_v24 = vmul.f32 %v3165_v10, %v840_v51  ;;  %2429 = vrcp.f32 %v693_v5  ;;  %v1279_v4 = vpack.c.bf16 %v1246_v35, %v1245_v59  ;;  %v3633_v51 = vld [vmem:[#allocation15_spill] sm:$0xff]  ;;  %vm999_vm15 = vcmp.ge.u32.totalorder %v935_v47, 429496729  ;;  %v3639_v59 = vld [vmem:[#allocation21_spill] sm:$0xff]  ;;  %v947_v47 = vld [vmem:[#allocation7 + $0x190] sm:$0xff] }
 0x1fd   :  { %v2420_v0 = vpop.eup %2419  ;;  %2163 = vmatprep.mubr.msk.bf16.mxu1 %vm192_vm0, %v1173_v25  ;;  %v1067_v13 = vmul.f32 %v3167_v38, %v854_v49  ;;  %v1275_v38 = vpack.c.bf16 %v1238_v21, %v1237_v23 }
 0x1fe   :  { %v2422_v28 = vpop.eup %2421  ;;  %v1124_v55 = vsel %vm996_vm8, %v1060_v24, 0.0  ;;  %v856_v29 = vmul.f32 1.1111112, %v2420_v0  ;;  %v696_v43 = vpop.xlane.xlu1 %695  ;;  %v3634_v24 = vld [vmem:[#allocation16_spill] sm:$0xff]  ;;  %vm1011_vm8 = vcmp.ge.u32.totalorder %v947_v47, 429496729 }
 0x1ff   :  { %v717_v10 = vpop.xlane.xlu0 %716  ;;  %v1170_v37 = vpack.c.bf16 %v1124_v55, %v1123_v31  ;;  %v842_v14 = vmul.f32 1.1111112, %v2422_v28  ;;  %2431 = vrcp.f32 %v696_v43  ;;  %v1131_v34 = vsel %vm1003_vm9, %v1067_v13, 0.0  ;;  %v943_v0 = vld [vmem:[#allocation7 + $0x170] sm:$0xff]  ;;  %v3635_v13 = vld [vmem:[#allocation17_spill] sm:$0xff] }
 0x200   :  { %v1068_v42 = vmul.f32 %v3175_v44, %v856_v29  ;;  %2433 = vrcp.f32 %v717_v10  ;;  %v1280_v55 = vpack.c.bf16 %v1248_v46, %v1247_v9  ;;  %v944_v43 = vld [vmem:[#allocation7 + $0x178] sm:$0xff]  ;;  %vm1007_vm2 = vcmp.ge.u32.totalorder %v943_v0, 429496729 }
 0x201   :  { %v2424_v45 = vpop.eup %2423  ;;  %2148 = vmatmul.mubr.msk.bf16.vlgmr.msra.gmra.mrb[16].mxu0 %vm192_vm0, %v1170_v37  ;;  %v1061_v11 = vmul.f32 %v3179_v1, %v842_v14  ;;  %v1276_v1 = vpack.c.bf16 %v1240_v30, %v1239_v53  ;;  %v3636_v14 = vld [vmem:[#allocation18_spill] sm:$0xff]  ;;  %vm1008_vm3 = vcmp.ge.u32.totalorder %v944_v43, 429496729  ;;  %v952_v47 = vld [vmem:[#allocation7 + $0x1b8] sm:$0xff] }
 0x202   :  { %v2426_v57 = vpop.eup %2425  ;;  %v1132_v22 = vsel %vm1004_vm10, %v1068_v42, 0.0  ;;  %v844_v26 = vmul.f32 1.1111112, %v2424_v45  ;;  %v720_v44 = vpop.xlane.xlu1 %719  ;;  %2172 = vmatpush3.bf16.msra.mxu0 %v3372_v62 }
 0x203   :  { %v723_v33 = vpop.xlane.xlu0 %722  ;;  %v1174_v8 = vpack.c.bf16 %v1132_v22, %v1131_v34  ;;  %v858_v7 = vmul.f32 1.1111112, %v2426_v57  ;;  %2435 = vrcp.f32 %v720_v44  ;;  %2173 = vmatprep.subr.bf16.mxu0 %v1274_v52  ;;  %v1125_v62 = vsel %vm997_vm11, %v1061_v11, 0.0  ;;  %v946_v34 = vld [vmem:[#allocation7 + $0x188] sm:$0xff] }
 0x204   :  { %v1062_v18 = vmul.f32 %v3631_v27, %v844_v26  ;;  %2437 = vrcp.f32 %v723_v33  ;;  %v3638_v33 = vld [vmem:[#allocation20_spill] sm:$0xff]  ;;  %vm1010_vm5 = vcmp.ge.u32.totalorder %v946_v34, 429496729 }
 0x205   :  { %v2428_v2 = vpop.eup %2427  ;;  %2164 = vmatmul.mubr.msk.bf16.vlgmr.msra.gmra.mrb[16].mxu1 %vm192_vm0, %v1174_v8  ;;  %v1069_v48 = vmul.f32 %v3632_v32, %v858_v7  ;;  %v953_v8 = vld [vmem:[#allocation7 + $0x1c0] sm:$0xff] }
 0x206   :  { %v2430_v61 = vpop.eup %2429  ;;  %v1126_v40 = vsel %vm998_vm12, %v1062_v18, 0.0  ;;  %v860_v56 = vmul.f32 1.1111112, %v2428_v2  ;;  %v726_v39 = vpop.xlane.xlu1 %725  ;;  %2174 = vmatpush3.bf16.msra.mxu0 %v1274_v52  ;;  %2188 = vmatpush3.bf16.msra.mxu1 %v3380_v6  ;;  %v954_v2 = vld [vmem:[#allocation7 + $0x1c8] sm:$0xff]  ;;  %vm1017_vm6 = vcmp.ge.u32.totalorder %v953_v8, 429496729 }
 0x207   :  { %v747_v36 = vpop.xlane.xlu0 %746  ;;  %v846_v58 = vmul.f32 1.1111112, %v2430_v61  ;;  %2439 = vrcp.f32 %v726_v39  ;;  %v1171_v20 = vpack.c.bf16 %v1126_v40, %v1125_v62  ;;  %2175 = vmatprep.subr.bf16.mxu0 %v1275_v38  ;;  %2189 = vmatprep.subr.bf16.mxu1 %v1278_v19  ;;  %v1133_v25 = vsel %vm1005_vm13, %v1069_v48, 0.0  ;;  %v3640_v32 = vld [vmem:[#allocation22_spill] sm:$0xff] }
 0x208   :  { %v1070_v12 = vmul.f32 %v3633_v51, %v860_v56  ;;  %2441 = vrcp.f32 %v747_v36  ;;  %vm1018_vm7 = vcmp.ge.u32.totalorder %v954_v2, 429496729  ;;  %v948_v51 = vld [vmem:[#allocation7 + $0x198] sm:$0xff]  ;;  %v3648_v2 = vld [vmem:[#allocation31_spill] sm:$0xff] }
 0x209   :  { %v2432_v5 = vpop.eup %2431  ;;  %2151 = vmatprep.mubr.msk.bf16.mxu0 %vm192_vm0, %v1171_v20  ;;  %v1063_v54 = vmul.f32 %v3634_v24, %v846_v58  ;;  %v3641_v20 = vld [vmem:[#allocation23_spill] sm:$0xff]  ;;  %v955_v24 = vld [vmem:[#allocation7 + $0x1d0] sm:$0xff]  ;;  %vm1012_vm9 = vcmp.ge.u32.totalorder %v948_v51, 429496729 }
 0x20a   :  { %v2434_v49 = vpop.eup %2433  ;;  %v1134_v6 = vsel %vm1006_vm14, %v1070_v12, 0.0  ;;  %v848_v15 = vmul.f32 1.1111112, %v2432_v5  ;;  %v750_v63 = vpop.xlane.xlu1 %749  ;;  %2176 = vmatpush3.bf16.msra.mxu0 %v1275_v38  ;;  %2190 = vmatpush3.bf16.msra.mxu1 %v1278_v19  ;;  %v3637_v38 = vld [vmem:[#allocation19_spill] sm:$0xff]  ;;  %vm1019_vm10 = vcmp.ge.u32.totalorder %v955_v24, 429496729 }
 0x20b   :  { %v729_v50 = vpop.xlane.xlu0 %728  ;;  %v862_v28 = vmul.f32 1.1111112, %v2434_v49  ;;  %2443 = vrcp.f32 %v750_v63  ;;  %v1175_v31 = vpack.c.bf16 %v1134_v6, %v1133_v25  ;;  %2177 = vmatprep.subr.bf16.mxu0 %v1276_v1  ;;  %2191 = vmatprep.subr.bf16.mxu1 %v1279_v4  ;;  %v1127_v21 = vsel %vm999_vm15, %v1063_v54, 0.0  ;;  %v3642_v49 = vld [vmem:[#allocation24_spill] sm:$0xff] }
 0x20c   :  { %v1064_v29 = vmul.f32 %v3635_v13, %v848_v15  ;;  %2445 = vrcp.f32 %v729_v50  ;;  %v3643_v50 = vld [vmem:[#allocation25_spill] sm:$0xff] }
 0x20d   :  { %v2436_v10 = vpop.eup %2435  ;;  %2167 = vmatprep.mubr.msk.bf16.mxu1 %vm192_vm0, %v1175_v31  ;;  %v1071_v52 = vmul.f32 %v3636_v14, %v862_v28  ;;  %v956_v31 = vld [vmem:[#allocation7 + $0x1d8] sm:$0xff] }
 0x20e   :  { %v2438_v23 = vpop.eup %2437  ;;  %v1128_v37 = vsel %vm1000_vm1, %v1064_v29, 0.0  ;;  %v864_v42 = vmul.f32 1.1111112, %v2436_v10  ;;  %v732_v60 = vpop.xlane.xlu1 %731  ;;  %2178 = vmatpush3.bf16.msra.mxu0 %v1276_v1  ;;  %2192 = vmatpush3.bf16.msra.mxu1 %v1279_v4  ;;  %v3644_v10 = vld [vmem:[#allocation26_spill] sm:$0xff]  ;;  %vm1020_vm11 = vcmp.ge.u32.totalorder %v956_v31, 429496729 }
 0x20f   :  { %v753_v45 = vpop.xlane.xlu0 %752  ;;  %v866_v16 = vmul.f32 1.1111112, %v2438_v23  ;;  %2447 = vrcp.f32 %v732_v60  ;;  %v1172_v41 = vpack.c.bf16 %v1128_v37, %v1127_v21  ;;  %2193 = vmatprep.subr.bf16.mxu1 %v1280_v55  ;;  %v1135_v26 = vsel %vm1007_vm2, %v1071_v52, 0.0  ;;  %v949_v37 = vld [vmem:[#allocation7 + $0x1a0] sm:$0xff]  ;;  %v3645_v60 = vld [vmem:[#allocation27_spill] sm:$0xff] }
 0x210   :  { %v1072_v57 = vmul.f32 %v3637_v38, %v864_v42  ;;  %2449 = vrcp.f32 %v753_v45  ;;  %vm1013_vm12 = vcmp.ge.u32.totalorder %v949_v37, 429496729  ;;  %vm1016_vm2 = vcmp.ge.u32.totalorder %v952_v47, 429496729 }
 0x211   :  { %v2440_v22 = vpop.eup %2439  ;;  %2152 = vmatmul.mubr.msk.bf16.gmra.mrb[20].mxu0 %vm192_vm0, %v1172_v41  ;;  %v1073_v53 = vmul.f32 %v3638_v33, %v866_v16  ;;  %v950_v16 = vld [vmem:[#allocation7 + $0x1a8] sm:$0xff] }
 0x212   :  { %v2442_v11 = vpop.eup %2441  ;;  %v1136_v44 = vsel %vm1008_vm3, %v1072_v57, 0.0  ;;  %v868_v30 = vmul.f32 1.1111112, %v2440_v22  ;;  %v756_v7 = vpop.xlane.xlu1 %755  ;;  %2194 = vmatpush3.bf16.msra.mxu1 %v1280_v55  ;;  %v3646_v22 = vld [vmem:[#allocation28_spill] sm:$0xff]  ;;  %vm1014_vm13 = vcmp.ge.u32.totalorder %v950_v16, 429496729 }
 0x213   :  { %v735_v19 = vpop.xlane.xlu0 %734  ;;  %v882_v27 = vmul.f32 1.1111112, %v2442_v11  ;;  %2451 = vrcp.f32 %v756_v7  ;;  %v1176_v18 = vpack.c.bf16 %v1136_v44, %v1135_v26  ;;  %v1137_v62 = vsel %vm1009_vm4, %v1073_v53, 0.0  ;;  %v957_v7 = vld [vmem:[#allocation7 + $0x1e0] sm:$0xff] }
 0x214   :  { %v1074_v35 = vmul.f32 %v3639_v59, %v868_v30  ;;  %2453 = vrcp.f32 %v735_v19  ;;  %v3647_v30 = vld [vmem:[#allocation30_spill] sm:$0xff]  ;;  %v958_v19 = vld [vmem:[#allocation7 + $0x1e8] sm:$0xff]  ;;  %vm1021_vm14 = vcmp.ge.u32.totalorder %v957_v7, 429496729 }
 0x215   :  { %v2444_v1 = vpop.eup %2443  ;;  %2168 = vmatmul.mubr.msk.bf16.gmra.mrb[20].mxu1 %vm192_vm0, %v1176_v18  ;;  %v1081_v48 = vmul.f32 %v3640_v32, %v882_v27  ;;  %vm1022_vm15 = vcmp.ge.u32.totalorder %v958_v19, 429496729  ;;  %v3649_v32 = vld [vmem:[#allocation32_spill] sm:$0xff] }
 0x216   :  { %v2446_v61 = vpop.eup %2445  ;;  %v1138_v40 = vsel %vm1010_vm5, %v1074_v35, 0.0  ;;  %v884_v56 = vmul.f32 1.1111112, %v2444_v1  ;;  %v738_v3 = vpop.xlane.xlu1 %737 }
 0x217   :  { %v759_v39 = vpop.xlane.xlu0 %758  ;;  %v870_v36 = vmul.f32 1.1111112, %v2446_v61  ;;  %2455 = vrcp.f32 %v738_v3  ;;  %v1177_v58 = vpack.c.bf16 %v1138_v40, %v1137_v62  ;;  %v1145_v46 = vsel %vm1017_vm6, %v1081_v48, 0.0 }
 0x218   :  { %v1082_v4 = vmul.f32 %v3641_v20, %v884_v56  ;;  %2457 = vrcp.f32 %v759_v39  ;;  %v951_v56 = vld [vmem:[#allocation7 + $0x1b0] sm:$0xff]  ;;  %v3650_v20 = vld [vmem:[#allocation33_spill] sm:$0xff] }
 0x219   :  { %v2448_v12 = vpop.eup %2447  ;;  %2179 = vmatprep.mubr.msk.bf16.mxu0 %vm192_vm0, %v1177_v58  ;;  %v1075_v25 = vmul.f32 %v3642_v49, %v870_v36  ;;  %vm1015_vm1 = vcmp.ge.u32.totalorder %v951_v56, 429496729  ;;  %v959_v49 = vld [vmem:[#allocation7 + $0x1f0] sm:$0xff] }
 0x21a   :  { %v2450_v9 = vpop.eup %2449  ;;  %v1146_v5 = vsel %vm1018_vm7, %v1082_v4, 0.0  ;;  %v872_v6 = vmul.f32 1.1111112, %v2448_v12  ;;  %v762_v54 = vpop.xlane.xlu1 %761  ;;  %vm1023_vm3 = vcmp.ge.u32.totalorder %v959_v49, 429496729 }
 0x21b   :  { %v741_v15 = vpop.xlane.xlu0 %740  ;;  %v886_v0 = vmul.f32 1.1111112, %v2450_v9  ;;  %2459 = vrcp.f32 %v762_v54  ;;  %v1181_v63 = vpack.c.bf16 %v1146_v5, %v1145_v46  ;;  %v1139_v29 = vsel %vm1011_vm8, %v1075_v25, 0.0  ;;  %v3651_v46 = vld [vmem:[#allocation34_spill] sm:$0xff]  ;;  %v960_v25 = vld [vmem:[#allocation7 + $0x1f8] sm:$0xff] }
 0x21c   :  { %v1076_v28 = vmul.f32 %v3643_v50, %v872_v6  ;;  %2461 = vrcp.f32 %v741_v15  ;;  %v3652_v15 = vld [vmem:[#allocation35_spill] sm:$0xff]  ;;  %vm1024_vm4 = vcmp.ge.u32.totalorder %v960_v25, 429496729 }
 0x21d   :  { %v2452_v55 = vpop.eup %2451  ;;  %2195 = vmatprep.mubr.msk.bf16.mxu1 %vm192_vm0, %v1181_v63  ;;  %v1083_v23 = vmul.f32 %v3644_v10, %v886_v0 }
 0x21e   :  { %v2454_v13 = vpop.eup %2453  ;;  %v1140_v43 = vsel %vm1012_vm9, %v1076_v28, 0.0  ;;  %v888_v21 = vmul.f32 1.1111112, %v2452_v55  ;;  %v744_v14 = vpop.xlane.xlu1 %743  ;;  %v3653_v28 = vld [vmem:[#allocation36_spill] sm:$0xff] }
 0x21f   :  { %v765_v52 = vpop.xlane.xlu0 %764  ;;  %v1178_v42 = vpack.c.bf16 %v1140_v43, %v1139_v29  ;;  %v874_v17 = vmul.f32 1.1111112, %v2454_v13  ;;  %2463 = vrcp.f32 %v744_v14  ;;  %v1147_v57 = vsel %vm1019_vm10, %v1083_v23, 0.0 }
 0x220   :  { %v1084_v45 = vmul.f32 %v3645_v60, %v888_v21  ;;  %2465 = vrcp.f32 %v765_v52 }
 0x221   :  { %v2456_v41 = vpop.eup %2455  ;;  %2180 = vmatmul.mubr.msk.bf16.vlgmr.msra.gmra.mrb[24].mxu0 %vm192_vm0, %v1178_v42  ;;  %v1077_v11 = vmul.f32 %v3646_v22, %v874_v17 }
 0x222   :  { %v2458_v38 = vpop.eup %2457  ;;  %v1148_v34 = vsel %vm1020_vm11, %v1084_v45, 0.0  ;;  %v876_v26 = vmul.f32 1.1111112, %v2456_v41  ;;  %v768_v44 = vpop.xlane.xlu1 %767 }
 0x223   :  { %v1182_v33 = vpack.c.bf16 %v1148_v34, %v1147_v57  ;;  %v890_v53 = vmul.f32 1.1111112, %v2458_v38  ;;  %2467 = vrcp.f32 %v768_v44  ;;  %v1141_v59 = vsel %vm1013_vm12, %v1077_v11, 0.0 }
 0x224   :  { %v1078_v8 = vmul.f32 %v3647_v30, %v876_v26 }
 0x225   :  { %v2460_v27 = vpop.eup %2459  ;;  %2196 = vmatmul.mubr.msk.bf16.vlgmr.msra.gmra.mrb[24].mxu1 %vm192_vm0, %v1182_v33  ;;  %v1085_v1 = vmul.f32 %v3648_v2, %v890_v53 }
 0x226   :  { %v2462_v18 = vpop.eup %2461  ;;  %v1142_v35 = vsel %vm1014_vm13, %v1078_v8, 0.0  ;;  %v892_v61 = vmul.f32 1.1111112, %v2460_v27 }
 0x227   :  { %v878_v62 = vmul.f32 1.1111112, %v2462_v18  ;;  %v1179_v40 = vpack.c.bf16 %v1142_v35, %v1141_v59  ;;  %v1149_v36 = vsel %vm1021_vm14, %v1085_v1, 0.0 }
 0x228   :  { %v1086_v48 = vmul.f32 %v3649_v32, %v892_v61 }
 0x229   :  { %v2464_v3 = vpop.eup %2463  ;;  %2183 = vmatprep.mubr.msk.bf16.mxu0 %vm192_vm0, %v1179_v40  ;;  %v1079_v4 = vmul.f32 %v3650_v20, %v878_v62 }
 0x22a   :  { %v2466_v39 = vpop.eup %2465  ;;  %v1150_v58 = vsel %vm1022_vm15, %v1086_v48, 0.0  ;;  %v880_v51 = vmul.f32 1.1111112, %v2464_v3 }
 0x22b   :  { %v894_v12 = vmul.f32 1.1111112, %v2466_v39  ;;  %v1183_v9 = vpack.c.bf16 %v1150_v58, %v1149_v36  ;;  %v1143_v24 = vsel %vm1015_vm1, %v1079_v4, 0.0 }
 0x22c   :  { %v1080_v5 = vmul.f32 %v3651_v46, %v880_v51 }
 0x22d   :  { %v2468_v6 = vpop.eup %2467  ;;  %2199 = vmatprep.mubr.msk.bf16.mxu1 %vm192_vm0, %v1183_v9  ;;  %v1087_v0 = vmul.f32 %v3652_v15, %v894_v12 }
 0x22e   :  { %v1144_v54 = vsel %vm1016_vm2, %v1080_v5, 0.0  ;;  %v896_v63 = vmul.f32 1.1111112, %v2468_v6 }
 0x22f   :  { %v1180_v50 = vpack.c.bf16 %v1144_v54, %v1143_v24  ;;  %v1151_v55 = vsel %vm1023_vm3, %v1087_v0, 0.0 }
 0x230   :  { %v1088_v31 = vmul.f32 %v3653_v28, %v896_v63 }
 0x231   :  { %2184 = vmatmul.mubr.msk.bf16.gmra.mrb[28].mxu0 %vm192_vm0, %v1180_v50 }
 0x232   :  { %v1152_v13 = vsel %vm1024_vm4, %v1088_v31, 0.0 }
 0x233   :  { %v1184_v29 = vpack.c.bf16 %v1152_v13, %v1151_v55 }
 0x235   :  { %2200 = vmatmul.mubr.msk.bf16.gmra.mrb[28].mxu1 %vm192_vm0, %v1184_v29 }
 0x294   :  { %v2085_v43 = vpop.f32.mrb[0].mxu0 }
 0x295   :  { %1899 = vst.msk [vmem:[#allocation10 + $0x10] sm:$0xff] %vm192_vm0, %v2085_v43  ;;  %v1327_v10 = vpop.f32.mrb[1].mxu0 }
 0x296   :  { %1897 = vst.msk [vmem:[#allocation10] sm:$0xff] %vm192_vm0, %v1327_v10  ;;  %v2086_v23 = vpop.f32.mrb[2].mxu0 }
 0x297   :  { %1900 = vst.msk [vmem:[#allocation10 + $0x18] sm:$0xff] %vm192_vm0, %v2086_v23  ;;  %v1330_v21 = vpop.f32.mrb[3].mxu0 }
 0x298   :  { %1898 = vst.msk [vmem:[#allocation10 + $0x8] sm:$0xff] %vm192_vm0, %v1330_v21  ;;  %v2101_v37 = vpop.f32.mrb[0].mxu1 }
 0x299   :  { %1907 = vst.msk [vmem:[#allocation10 + $0x50] sm:$0xff] %vm192_vm0, %v2101_v37  ;;  %v1404_v14 = vpop.f32.mrb[1].mxu1 }
 0x29a   :  { %1905 = vst.msk [vmem:[#allocation10 + $0x40] sm:$0xff] %vm192_vm0, %v1404_v14  ;;  %v2102_v52 = vpop.f32.mrb[2].mxu1 }
 0x29b   :  { %1908 = vst.msk [vmem:[#allocation10 + $0x58] sm:$0xff] %vm192_vm0, %v2102_v52  ;;  %v1407_v42 = vpop.f32.mrb[3].mxu1 }
 0x29c   :  { %1906 = vst.msk [vmem:[#allocation10 + $0x48] sm:$0xff] %vm192_vm0, %v1407_v42 }
 0x2a4   :  { %v2089_v17 = vpop.f32.mrb[4].mxu0 }
 0x2a5   :  { %1903 = vst.msk [vmem:[#allocation10 + $0x30] sm:$0xff] %vm192_vm0, %v2089_v17  ;;  %v1343_v60 = vpop.f32.mrb[5].mxu0 }
 0x2a6   :  { %1901 = vst.msk [vmem:[#allocation10 + $0x20] sm:$0xff] %vm192_vm0, %v1343_v60  ;;  %v2090_v45 = vpop.f32.mrb[6].mxu0 }
 0x2a7   :  { %1904 = vst.msk [vmem:[#allocation10 + $0x38] sm:$0xff] %vm192_vm0, %v2090_v45  ;;  %v1346_v16 = vpop.f32.mrb[7].mxu0 }
 0x2a8   :  { %1902 = vst.msk [vmem:[#allocation10 + $0x28] sm:$0xff] %vm192_vm0, %v1346_v16  ;;  %v2105_v41 = vpop.f32.mrb[4].mxu1 }
 0x2a9   :  { %1911 = vst.msk [vmem:[#allocation10 + $0x70] sm:$0xff] %vm192_vm0, %v2105_v41  ;;  %v1420_v38 = vpop.f32.mrb[5].mxu1 }
 0x2aa   :  { %1909 = vst.msk [vmem:[#allocation10 + $0x60] sm:$0xff] %vm192_vm0, %v1420_v38  ;;  %v2106_v57 = vpop.f32.mrb[6].mxu1 }
 0x2ab   :  { %1912 = vst.msk [vmem:[#allocation10 + $0x78] sm:$0xff] %vm192_vm0, %v2106_v57  ;;  %v1423_v34 = vpop.f32.mrb[7].mxu1 }
 0x2ac   :  { %1910 = vst.msk [vmem:[#allocation10 + $0x68] sm:$0xff] %vm192_vm0, %v1423_v34 }
 0x2b4   :  { %v2117_v22 = vpop.f32.mrb[8].mxu0 }
 0x2b5   :  { %1915 = vst.msk [vmem:[#allocation10 + $0x90] sm:$0xff] %vm192_vm0, %v2117_v22  ;;  %v1481_v11 = vpop.f32.mrb[9].mxu0 }
 0x2b6   :  { %1913 = vst.msk [vmem:[#allocation10 + $0x80] sm:$0xff] %vm192_vm0, %v1481_v11  ;;  %v2118_v26 = vpop.f32.mrb[10].mxu0 }
 0x2b7   :  { %1916 = vst.msk [vmem:[#allocation10 + $0x98] sm:$0xff] %vm192_vm0, %v2118_v26  ;;  %v1484_v44 = vpop.f32.mrb[11].mxu0 }
 0x2b8   :  { %1914 = vst.msk [vmem:[#allocation10 + $0x88] sm:$0xff] %vm192_vm0, %v1484_v44  ;;  %v2133_v33 = vpop.f32.mrb[8].mxu1 }
 0x2b9   :  { %1923 = vst.msk [vmem:[#allocation10 + $0xd0] sm:$0xff] %vm192_vm0, %v2133_v33  ;;  %v1558_v53 = vpop.f32.mrb[9].mxu1 }
 0x2ba   :  { %1921 = vst.msk [vmem:[#allocation10 + $0xc0] sm:$0xff] %vm192_vm0, %v1558_v53  ;;  %v2134_v30 = vpop.f32.mrb[10].mxu1 }
 0x2bb   :  { %1924 = vst.msk [vmem:[#allocation10 + $0xd8] sm:$0xff] %vm192_vm0, %v2134_v30  ;;  %v1561_v8 = vpop.f32.mrb[11].mxu1 }
 0x2bc   :  { %1922 = vst.msk [vmem:[#allocation10 + $0xc8] sm:$0xff] %vm192_vm0, %v1561_v8 }
 0x2c4   :  { %v2121_v7 = vpop.f32.mrb[12].mxu0 }
 0x2c5   :  { %1919 = vst.msk [vmem:[#allocation10 + $0xb0] sm:$0xff] %vm192_vm0, %v2121_v7  ;;  %v1497_v19 = vpop.f32.mrb[13].mxu0 }
 0x2c6   :  { %1917 = vst.msk [vmem:[#allocation10 + $0xa0] sm:$0xff] %vm192_vm0, %v1497_v19  ;;  %v2122_v27 = vpop.f32.mrb[14].mxu0 }
 0x2c7   :  { %1920 = vst.msk [vmem:[#allocation10 + $0xb8] sm:$0xff] %vm192_vm0, %v2122_v27  ;;  %v1500_v18 = vpop.f32.mrb[15].mxu0 }
 0x2c8   :  { %1918 = vst.msk [vmem:[#allocation10 + $0xa8] sm:$0xff] %vm192_vm0, %v1500_v18  ;;  %v2137_v59 = vpop.f32.mrb[12].mxu1 }
 0x2c9   :  { %1927 = vst.msk [vmem:[#allocation10 + $0xf0] sm:$0xff] %vm192_vm0, %v2137_v59  ;;  %v1574_v35 = vpop.f32.mrb[13].mxu1 }
 0x2ca   :  { %1925 = vst.msk [vmem:[#allocation10 + $0xe0] sm:$0xff] %vm192_vm0, %v1574_v35  ;;  %v2138_v2 = vpop.f32.mrb[14].mxu1 }
 0x2cb   :  { %1928 = vst.msk [vmem:[#allocation10 + $0xf8] sm:$0xff] %vm192_vm0, %v2138_v2  ;;  %v1577_v1 = vpop.f32.mrb[15].mxu1 }
 0x2cc   :  { %1926 = vst.msk [vmem:[#allocation10 + $0xe8] sm:$0xff] %vm192_vm0, %v1577_v1 }
 0x2d4   :  { %v2149_v61 = vpop.f32.mrb[16].mxu0 }
 0x2d5   :  { %1931 = vst.msk [vmem:[#allocation10 + $0x110] sm:$0xff] %vm192_vm0, %v2149_v61  ;;  %v1635_v62 = vpop.f32.mrb[17].mxu0 }
 0x2d6   :  { %1929 = vst.msk [vmem:[#allocation10 + $0x100] sm:$0xff] %vm192_vm0, %v1635_v62  ;;  %v2150_v40 = vpop.f32.mrb[18].mxu0 }
 0x2d7   :  { %1932 = vst.msk [vmem:[#allocation10 + $0x118] sm:$0xff] %vm192_vm0, %v2150_v40  ;;  %v1638_v32 = vpop.f32.mrb[19].mxu0 }
 0x2d8   :  { %1930 = vst.msk [vmem:[#allocation10 + $0x108] sm:$0xff] %vm192_vm0, %v1638_v32  ;;  %v2165_v48 = vpop.f32.mrb[16].mxu1 }
 0x2d9   :  { %1939 = vst.msk [vmem:[#allocation10 + $0x150] sm:$0xff] %vm192_vm0, %v2165_v48  ;;  %v1712_v56 = vpop.f32.mrb[17].mxu1 }
 0x2da   :  { %1937 = vst.msk [vmem:[#allocation10 + $0x140] sm:$0xff] %vm192_vm0, %v1712_v56  ;;  %v2166_v47 = vpop.f32.mrb[18].mxu1 }
 0x2db   :  { %1940 = vst.msk [vmem:[#allocation10 + $0x158] sm:$0xff] %vm192_vm0, %v2166_v47  ;;  %v1715_v3 = vpop.f32.mrb[19].mxu1 }
 0x2dc   :  { %1938 = vst.msk [vmem:[#allocation10 + $0x148] sm:$0xff] %vm192_vm0, %v1715_v3 }
 0x2e4   :  { %v2153_v39 = vpop.f32.mrb[20].mxu0 }
 0x2e5   :  { %1935 = vst.msk [vmem:[#allocation10 + $0x130] sm:$0xff] %vm192_vm0, %v2153_v39  ;;  %v1651_v36 = vpop.f32.mrb[21].mxu0 }
 0x2e6   :  { %1933 = vst.msk [vmem:[#allocation10 + $0x120] sm:$0xff] %vm192_vm0, %v1651_v36  ;;  %v2154_v58 = vpop.f32.mrb[22].mxu0 }
 0x2e7   :  { %1936 = vst.msk [vmem:[#allocation10 + $0x138] sm:$0xff] %vm192_vm0, %v2154_v58  ;;  %v1654_v20 = vpop.f32.mrb[23].mxu0 }
 0x2e8   :  { %1934 = vst.msk [vmem:[#allocation10 + $0x128] sm:$0xff] %vm192_vm0, %v1654_v20  ;;  %v2169_v4 = vpop.f32.mrb[20].mxu1 }
 0x2e9   :  { %1943 = vst.msk [vmem:[#allocation10 + $0x170] sm:$0xff] %vm192_vm0, %v2169_v4  ;;  %v1728_v51 = vpop.f32.mrb[21].mxu1 }
 0x2ea   :  { %1941 = vst.msk [vmem:[#allocation10 + $0x160] sm:$0xff] %vm192_vm0, %v1728_v51  ;;  %v2170_v12 = vpop.f32.mrb[22].mxu1 }
 0x2eb   :  { %1944 = vst.msk [vmem:[#allocation10 + $0x178] sm:$0xff] %vm192_vm0, %v2170_v12  ;;  %v1731_v9 = vpop.f32.mrb[23].mxu1 }
 0x2ec   :  { %1942 = vst.msk [vmem:[#allocation10 + $0x168] sm:$0xff] %vm192_vm0, %v1731_v9 }
 0x2f4   :  { %v2181_v46 = vpop.f32.mrb[24].mxu0 }
 0x2f5   :  { %1947 = vst.msk [vmem:[#allocation10 + $0x190] sm:$0xff] %vm192_vm0, %v2181_v46  ;;  %v1789_v5 = vpop.f32.mrb[25].mxu0 }
 0x2f6   :  { %1945 = vst.msk [vmem:[#allocation10 + $0x180] sm:$0xff] %vm192_vm0, %v1789_v5  ;;  %v2182_v49 = vpop.f32.mrb[26].mxu0 }
 0x2f7   :  { %1948 = vst.msk [vmem:[#allocation10 + $0x198] sm:$0xff] %vm192_vm0, %v2182_v49  ;;  %v1792_v25 = vpop.f32.mrb[27].mxu0 }
 0x2f8   :  { %1946 = vst.msk [vmem:[#allocation10 + $0x188] sm:$0xff] %vm192_vm0, %v1792_v25  ;;  %v2197_v6 = vpop.f32.mrb[24].mxu1 }
 0x2f9   :  { %1955 = vst.msk [vmem:[#allocation10 + $0x1d0] sm:$0xff] %vm192_vm0, %v2197_v6  ;;  %v1866_v24 = vpop.f32.mrb[25].mxu1 }
 0x2fa   :  { %1953 = vst.msk [vmem:[#allocation10 + $0x1c0] sm:$0xff] %vm192_vm0, %v1866_v24  ;;  %v2198_v54 = vpop.f32.mrb[26].mxu1 }
 0x2fb   :  { %1956 = vst.msk [vmem:[#allocation10 + $0x1d8] sm:$0xff] %vm192_vm0, %v2198_v54  ;;  %v1869_v15 = vpop.f32.mrb[27].mxu1 }
 0x2fc   :  { %1954 = vst.msk [vmem:[#allocation10 + $0x1c8] sm:$0xff] %vm192_vm0, %v1869_v15 }
 0x304   :  { %v2185_v0 = vpop.f32.mrb[28].mxu0 }
 0x305   :  { %1951 = vst.msk [vmem:[#allocation10 + $0x1b0] sm:$0xff] %vm192_vm0, %v2185_v0  ;;  %v1805_v63 = vpop.f32.mrb[29].mxu0 }
 0x306   :  { %1949 = vst.msk [vmem:[#allocation10 + $0x1a0] sm:$0xff] %vm192_vm0, %v1805_v63  ;;  %v2186_v50 = vpop.f32.mrb[30].mxu0 }
 0x307   :  { %1952 = vst.msk [vmem:[#allocation10 + $0x1b8] sm:$0xff] %vm192_vm0, %v2186_v50  ;;  %v1808_v28 = vpop.f32.mrb[31].mxu0 }
 0x308   :  { %1950 = vst.msk [vmem:[#allocation10 + $0x1a8] sm:$0xff] %vm192_vm0, %v1808_v28  ;;  %v2201_v31 = vpop.f32.mrb[28].mxu1 }
 0x309   :  { %1959 = vst.msk [vmem:[#allocation10 + $0x1f0] sm:$0xff] %vm192_vm0, %v2201_v31  ;;  %v1882_v55 = vpop.f32.mrb[29].mxu1 }
 0x30a   :  { %1957 = vst.msk [vmem:[#allocation10 + $0x1e0] sm:$0xff] %vm192_vm0, %v1882_v55  ;;  %v2202_v13 = vpop.f32.mrb[30].mxu1 }
 0x30b   :  { %1960 = vst.msk [vmem:[#allocation10 + $0x1f8] sm:$0xff] %vm192_vm0, %v2202_v13  ;;  %v1885_v29 = vpop.f32.mrb[31].mxu1 }
 0x30c   :  { %1958 = vst.msk [vmem:[#allocation10 + $0x1e8] sm:$0xff] %vm192_vm0, %v1885_v29 }
 0x30d   :  { %2546 = shalt.err (!%p2543_p0)
}
 0x30e   :  { %s2547_s7 = scalar_lea.hbm %s3539_s4, 8192 }
 0x30f   :  { %p2548_p1 = scmp.ne.s32.totalorder %s3539_s4, %s2547_s7  ;;  %p2551_p2 = scmp.lt.u32.totalorder %s2547_s7, %s3539_s4 }
 0x311   :  { %p2553_p3 = pnand %p2551_p2, %p2548_p1 }
 0x313   :  { %2556 = shalt.err (!%p2553_p3)
}
 0x314   :  { %1972 = dma.vmem_to_hbm [thread:$0]  %s1967_s3, 8192, %s3539_s4, [#allocation6], %s2565_s27, %s2565_s27, %s2566_s28  }
 0x315   :  { %2561 = dma.done.wait [#allocation6], 8192  }
 0x316   :  { %2562 = vsyncadd [#allocation6], 4294959104 }
 0x317   :  { %1976 = vsyncpa [#allocation5], 1 }
 0x318   :  { %1977 = vsyncpa [#allocation8], 1 }
 0x319   :  { %1978 = vsyncpa [#allocation6], 1 }

</bundles_post_ra>
